<compile_context>
chip_gen: v5e
topology: v5e:2x2
jax: 0.10.0
libtpu: 0.0.40
codegen_flags: <defaults>
</compile_context>

<pallas_src>
import functools
import math

import jax
import jax.numpy as jnp
from jax.experimental import pallas as pl
from jax.experimental.pallas import tpu as pltpu


def _mish(z):
    # Mish(z) = z * tanh(softplus(z)); tanh(log(1+e^z)) = ((1+e^z)^2-1)/((1+e^z)^2+1)
    # -> one EUP exp + near-free approx reciprocal instead of exp+log1p+tanh.
    e = jnp.exp(jnp.minimum(z, 20.0))
    u2 = (1.0 + e) * (1.0 + e)
    t = (u2 - 1.0) * pl.reciprocal(u2 + 1.0, approx=True)
    return jnp.where(z > 20.0, z, z * t)


def _mlp_kernel(
    x_ref, time_ref, state_ref, freqs_ref,
    wt1s_ref, wt1c_ref, bt1_ref, wt2_ref, bt2_ref,
    w1x_ref, w1t_ref, w1s_ref, b1_ref,
    w2_ref, b2_ref, w3_ref, b3_ref, w4_ref, b4_ref,
    out_ref,
):
    f32 = jnp.float32
    bf16 = jnp.bfloat16

    def mm(a, w_ref):
        # bf16 MXU operands, f32 accumulation.
        return jnp.dot(a.astype(bf16), w_ref[...].astype(bf16),
                       preferred_element_type=f32)

    # --- time_mlp: SinusoidalPosEmb -> Linear -> Mish -> Linear --------------
    t = time_ref[...].astype(f32)                       # [TB, 1]
    arg = t * freqs_ref[...].astype(f32)                # [TB, half_dim]
    sin_e, cos_e = jnp.sin(arg), jnp.cos(arg)
    # concat([sin, cos]) @ wt1 == sin @ wt1[:half] + cos @ wt1[half:]
    ht = _mish(mm(sin_e, wt1s_ref) + mm(cos_e, wt1c_ref) + bt1_ref[...])
    t_emb = mm(ht, wt2_ref) + bt2_ref[...]               # [TB, t_dim]

    # --- mid layers: concat([x, t_emb, state]) folded into split layer-1 dots -
    x = x_ref[...].astype(f32)
    s = state_ref[...].astype(f32)
    h = _mish(mm(x, w1x_ref) + mm(t_emb, w1t_ref) + mm(s, w1s_ref) + b1_ref[...])
    h = _mish(mm(h, w2_ref) + b2_ref[...])
    h = _mish(mm(h, w3_ref) + b3_ref[...])

    # --- final layer (lane-dense, column-padded) ------------------------------
    out_ref[...] = (mm(h, w4_ref) + b4_ref[...]).astype(out_ref.dtype)


@functools.partial(jax.jit, static_argnames=("t_dim", "block_batch"))
def mlp_forward(x, time, state, params, *, t_dim=16, block_batch=256):
    """Returns [B, action_dim] float32."""
    B, action_dim = x.shape
    state_dim = state.shape[1]
    hidden = params["w2"].shape[0]
    half = t_dim // 2
    bf16 = jnp.bfloat16

    # Sinusoidal frequencies (constant per call).
    freqs = jnp.exp(
        jnp.arange(half, dtype=jnp.float32) * (-math.log(10000.0) / (half - 1))
    ).reshape(1, half)

    x = x.astype(jnp.float32)
    state = state.astype(jnp.float32)
    time2d = jnp.reshape(time, (B, 1)).astype(jnp.float32)

    # --- batch tiling (8-aligned tiles; pad batch to a tile multiple) --------
    if B <= block_batch:
        TB, B_pad = B, B
    else:
        TB = block_batch
        B_pad = pl.cdiv(B, TB) * TB
    if B_pad != B:
        pad = B_pad - B
        x = jnp.pad(x, ((0, pad), (0, 0)))
        time2d = jnp.pad(time2d, ((0, pad), (0, 0)))
        state = jnp.pad(state, ((0, pad), (0, 0)))
    grid = (B_pad // TB,)

    # --- weights as bf16 matmul operands; biases stay f32 --------------------
    wt1 = params["wt1"].astype(bf16)
    wt1s, wt1c = wt1[:half], wt1[half:]
    wt2 = params["wt2"].astype(bf16)
    w1 = params["w1"].astype(bf16)
    w1x = w1[:action_dim]
    w1t = w1[action_dim:action_dim + t_dim]
    w1s = w1[action_dim + t_dim:]
    w2 = params["w2"].astype(bf16)
    w3 = params["w3"].astype(bf16)

    # Lane-dense output: pad final layer columns to a multiple of 128.
    out_pad = ((action_dim + 127) // 128) * 128
    w4 = jnp.zeros((hidden, out_pad), bf16).at[:, :action_dim].set(
        params["w4"].astype(bf16))
    b4 = jnp.zeros((1, out_pad), jnp.float32).at[:, :action_dim].set(
        params["b4"].astype(jnp.float32))

    bt1 = params["bt1"].astype(jnp.float32)
    bt2 = params["bt2"].astype(jnp.float32)
    b1 = params["b1"].astype(jnp.float32)
    b2 = params["b2"].astype(jnp.float32)
    b3 = params["b3"].astype(jnp.float32)

    def batch_spec(cols):
        return pl.BlockSpec((TB, cols), lambda i: (i, 0))

    def const_spec(a):
        # Full array, resident across all grid steps.
        return pl.BlockSpec(a.shape, lambda i: (0, 0))

    consts = (wt1s, wt1c, bt1, wt2, bt2, w1x, w1t, w1s, b1, w2, b2, w3, b3, w4, b4)

    out = pl.pallas_call(
        _mlp_kernel,
        grid=grid,
        in_specs=[batch_spec(action_dim), batch_spec(1), batch_spec(state_dim),
                  const_spec(freqs)] + [const_spec(a) for a in consts],
        out_specs=pl.BlockSpec((TB, out_pad), lambda i: (i, 0)),
        out_shape=jax.ShapeDtypeStruct((B_pad, out_pad), jnp.float32),
        compiler_params=pltpu.CompilerParams(
            dimension_semantics=("parallel",),
            vmem_limit_bytes=64 * 1024 * 1024,
        ),
    )(x, time2d, state, freqs, *consts)

    return out[:B, :action_dim]


def init_mlp_params(key, state_dim, action_dim, t_dim=16, hidden=256):
    """Shapes mirror the PyTorch module; weights stored [in, out], biases [1, out]."""
    input_dim = state_dim + action_dim + t_dim
    layout = [
        ("wt1", "bt1", t_dim, 2 * t_dim),
        ("wt2", "bt2", 2 * t_dim, t_dim),
        ("w1", "b1", input_dim, hidden),
        ("w2", "b2", hidden, hidden),
        ("w3", "b3", hidden, hidden),
        ("w4", "b4", hidden, action_dim),
    ]
    params = {}
    for wn, bn, fin, fout in layout:
        key, kw, kb = jax.random.split(key, 3)
        bound = 1.0 / (fin ** 0.5)  # PyTorch nn.Linear default uniform bound
        params[wn] = jax.random.uniform(kw, (fin, fout), jnp.float32, -bound, bound)
        params[bn] = jax.random.uniform(kb, (1, fout), jnp.float32, -bound, bound)
    return params


def _reference_forward(x, time, state, params, t_dim=16):
    half = t_dim // 2
    freqs = jnp.exp(
        jnp.arange(half, dtype=jnp.float32) * (-math.log(10000.0) / (half - 1)))
    emb = time.reshape(-1, 1).astype(jnp.float32) * freqs[None, :]
    temb = jnp.concatenate([jnp.sin(emb), jnp.cos(emb)], axis=-1)

    def mish(z):
        return z * jnp.tanh(jax.nn.softplus(z))

    t = mish(temb @ params["wt1"] + params["bt1"]) @ params["wt2"] + params["bt2"]
    h = jnp.concatenate([x, t, state], axis=-1)
    h = mish(h @ params["w1"] + params["b1"])
    h = mish(h @ params["w2"] + params["b2"])
    h = mish(h @ params["w3"] + params["b3"])
    return h @ params["w4"] + params["b4"]


if __name__ == "__main__":
    key = jax.random.PRNGKey(0)
    batch, state_dim, action_dim, t_dim, hidden = 8, 16, 8, 16, 256

    k1, k2, k3, kp = jax.random.split(key, 4)
    x = jax.random.normal(k1, (batch, action_dim), jnp.float32)
    time = jax.random.uniform(k2, (batch,), jnp.float32, 0.0, 10.0)
    state = jax.random.normal(k3, (batch, state_dim), jnp.float32)
    params = init_mlp_params(kp, state_dim, action_dim, t_dim=t_dim, hidden=hidden)

    out = mlp_forward(x, time, state, params, t_dim=t_dim)
    jax.block_until_ready(out)

    ref = _reference_forward(x, time, state, params, t_dim=t_dim)
    assert out.shape == (batch, action_dim)
    max_err = float(jnp.max(jnp.abs(out - ref)))
    # bf16 matmul operands + approx reciprocal -> loose-but-meaningful tolerance
    assert jnp.allclose(out, ref, atol=5e-2, rtol=5e-2), f"max_err={max_err}"

    print("KERNEL_OK")
</pallas_src>

<mosaic_0001>
module attributes {stable_mosaic.version = 11 : i64} {
  func.func @_mlp_kernel(%arg0: i32, %arg1: memref<8x8xf32, #tpu.memory_space<vmem>>, %arg2: memref<8x1xf32, #tpu.memory_space<vmem>>, %arg3: memref<8x16xf32, #tpu.memory_space<vmem>>, %arg4: memref<1x8xf32, #tpu.memory_space<vmem>>, %arg5: memref<8x32xbf16, #tpu.memory_space<vmem>>, %arg6: memref<8x32xbf16, #tpu.memory_space<vmem>>, %arg7: memref<1x32xf32, #tpu.memory_space<vmem>>, %arg8: memref<32x16xbf16, #tpu.memory_space<vmem>>, %arg9: memref<1x16xf32, #tpu.memory_space<vmem>>, %arg10: memref<8x256xbf16, #tpu.memory_space<vmem>>, %arg11: memref<16x256xbf16, #tpu.memory_space<vmem>>, %arg12: memref<16x256xbf16, #tpu.memory_space<vmem>>, %arg13: memref<1x256xf32, #tpu.memory_space<vmem>>, %arg14: memref<256x256xbf16, #tpu.memory_space<vmem>>, %arg15: memref<1x256xf32, #tpu.memory_space<vmem>>, %arg16: memref<256x256xbf16, #tpu.memory_space<vmem>>, %arg17: memref<1x256xf32, #tpu.memory_space<vmem>>, %arg18: memref<256x128xbf16, #tpu.memory_space<vmem>>, %arg19: memref<1x128xf32, #tpu.memory_space<vmem>>, %arg20: memref<8x128xf32, #tpu.memory_space<vmem>>) attributes {dimension_semantics = [#tpu.dimension_semantics<parallel>], iteration_bounds = array<i64: 1>, scalar_prefetch = 0 : i64, scratch_operands = 0 : i64, tpu.core_type = #tpu.core_type<tc>, window_params = [{transform_indices = @transform_0, window_bounds = array<i64: 8, 8>}, {transform_indices = @transform_1, window_bounds = array<i64: 8, 1>}, {transform_indices = @transform_2, window_bounds = array<i64: 8, 16>}, {pipeline_mode = #tpu.pipeline_mode<synchronous>, transform_indices = @transform_3, window_bounds = array<i64: 1, 8>}, {pipeline_mode = #tpu.pipeline_mode<synchronous>, transform_indices = @transform_4, window_bounds = array<i64: 8, 32>}, {pipeline_mode = #tpu.pipeline_mode<synchronous>, transform_indices = @transform_5, window_bounds = array<i64: 8, 32>}, {pipeline_mode = #tpu.pipeline_mode<synchronous>, transform_indices = @transform_6, window_bounds = array<i64: 1, 32>}, {pipeline_mode = #tpu.pipeline_mode<synchronous>, transform_indices = @transform_7, window_bounds = array<i64: 32, 16>}, {pipeline_mode = #tpu.pipeline_mode<synchronous>, transform_indices = @transform_8, window_bounds = array<i64: 1, 16>}, {pipeline_mode = #tpu.pipeline_mode<synchronous>, transform_indices = @transform_9, window_bounds = array<i64: 8, 256>}, {pipeline_mode = #tpu.pipeline_mode<synchronous>, transform_indices = @transform_10, window_bounds = array<i64: 16, 256>}, {pipeline_mode = #tpu.pipeline_mode<synchronous>, transform_indices = @transform_11, window_bounds = array<i64: 16, 256>}, {pipeline_mode = #tpu.pipeline_mode<synchronous>, transform_indices = @transform_12, window_bounds = array<i64: 1, 256>}, {pipeline_mode = #tpu.pipeline_mode<synchronous>, transform_indices = @transform_13, window_bounds = array<i64: 256, 256>}, {pipeline_mode = #tpu.pipeline_mode<synchronous>, transform_indices = @transform_14, window_bounds = array<i64: 1, 256>}, {pipeline_mode = #tpu.pipeline_mode<synchronous>, transform_indices = @transform_15, window_bounds = array<i64: 256, 256>}, {pipeline_mode = #tpu.pipeline_mode<synchronous>, transform_indices = @transform_16, window_bounds = array<i64: 1, 256>}, {pipeline_mode = #tpu.pipeline_mode<synchronous>, transform_indices = @transform_17, window_bounds = array<i64: 256, 128>}, {pipeline_mode = #tpu.pipeline_mode<synchronous>, transform_indices = @transform_18, window_bounds = array<i64: 1, 128>}, {transform_indices = @transform_19, window_bounds = array<i64: 8, 128>}]} {
    %c0 = arith.constant 0 : index
    %c0_0 = arith.constant 0 : index
    %0 = vector.load %arg2[%c0, %c0_0] : memref<8x1xf32, #tpu.memory_space<vmem>>, vector<8x1xf32>
    %c0_1 = arith.constant 0 : index
    %c0_2 = arith.constant 0 : index
    %1 = vector.load %arg4[%c0_1, %c0_2] : memref<1x8xf32, #tpu.memory_space<vmem>>, vector<1x8xf32>
    %2 = vector.broadcast %0 : vector<8x1xf32> to vector<8x8xf32>
    %3 = vector.broadcast %1 : vector<1x8xf32> to vector<8x8xf32>
    %4 = arith.mulf %2, %3 : vector<8x8xf32>
    %5 = math.sin %4 : vector<8x8xf32>
    %6 = math.cos %4 : vector<8x8xf32>
    %7 = arith.truncf %5 : vector<8x8xf32> to vector<8x8xbf16>
    %c0_3 = arith.constant 0 : index
    %c0_4 = arith.constant 0 : index
    %8 = vector.load %arg5[%c0_3, %c0_4] : memref<8x32xbf16, #tpu.memory_space<vmem>>, vector<8x32xbf16>
    %cst = arith.constant dense<0.000000e+00> : vector<8x32xf32>
    %9 = tpu.matmul %7, %8, %cst {dimension_numbers = #tpu.dot_dimension_numbers<[1], [0], [0], [1], [0, 0, 1, 1], [], []>} : vector<8x8xbf16>, vector<8x32xbf16>, vector<8x32xf32> -> vector<8x32xf32>
    %10 = arith.truncf %6 : vector<8x8xf32> to vector<8x8xbf16>
    %c0_5 = arith.constant 0 : index
    %c0_6 = arith.constant 0 : index
    %11 = vector.load %arg6[%c0_5, %c0_6] : memref<8x32xbf16, #tpu.memory_space<vmem>>, vector<8x32xbf16>
    %cst_7 = arith.constant dense<0.000000e+00> : vector<8x32xf32>
    %12 = tpu.matmul %10, %11, %cst_7 {dimension_numbers = #tpu.dot_dimension_numbers<[1], [0], [0], [1], [0, 0, 1, 1], [], []>} : vector<8x8xbf16>, vector<8x32xbf16>, vector<8x32xf32> -> vector<8x32xf32>
    %13 = arith.addf %9, %12 : vector<8x32xf32>
    %c0_8 = arith.constant 0 : index
    %c0_9 = arith.constant 0 : index
    %14 = vector.load %arg7[%c0_8, %c0_9] : memref<1x32xf32, #tpu.memory_space<vmem>>, vector<1x32xf32>
    %15 = vector.broadcast %14 : vector<1x32xf32> to vector<8x32xf32>
    %16 = arith.addf %13, %15 : vector<8x32xf32>
    %cst_10 = arith.constant 2.000000e+01 : f32
    %17 = vector.broadcast %cst_10 : f32 to vector<8x32xf32>
    %18 = arith.minimumf %16, %17 : vector<8x32xf32>
    %19 = math.exp %18 : vector<8x32xf32>
    %cst_11 = arith.constant 1.000000e+00 : f32
    %20 = vector.broadcast %cst_11 : f32 to vector<8x32xf32>
    %21 = arith.addf %20, %19 : vector<8x32xf32>
    %cst_12 = arith.constant 1.000000e+00 : f32
    %22 = vector.broadcast %cst_12 : f32 to vector<8x32xf32>
    %23 = arith.addf %22, %19 : vector<8x32xf32>
    %24 = arith.mulf %21, %23 : vector<8x32xf32>
    %cst_13 = arith.constant 1.000000e+00 : f32
    %25 = vector.broadcast %cst_13 : f32 to vector<8x32xf32>
    %26 = arith.subf %24, %25 : vector<8x32xf32>
    %cst_14 = arith.constant 1.000000e+00 : f32
    %27 = vector.broadcast %cst_14 : f32 to vector<8x32xf32>
    %28 = arith.addf %24, %27 : vector<8x32xf32>
    %29 = tpu.reciprocal %28 {approx = true} : vector<8x32xf32> -> vector<8x32xf32>
    %30 = arith.mulf %26, %29 : vector<8x32xf32>
    %cst_15 = arith.constant 2.000000e+01 : f32
    %31 = vector.broadcast %cst_15 : f32 to vector<8x32xf32>
    %32 = arith.cmpf ogt, %16, %31 : vector<8x32xf32>
    %33 = arith.mulf %16, %30 : vector<8x32xf32>
    %34 = arith.select %32, %16, %33 : vector<8x32xi1>, vector<8x32xf32>
    %35 = arith.truncf %34 : vector<8x32xf32> to vector<8x32xbf16>
    %c0_16 = arith.constant 0 : index
    %c0_17 = arith.constant 0 : index
    %36 = vector.load %arg8[%c0_16, %c0_17] : memref<32x16xbf16, #tpu.memory_space<vmem>>, vector<32x16xbf16>
    %cst_18 = arith.constant dense<0.000000e+00> : vector<8x16xf32>
    %37 = tpu.matmul %35, %36, %cst_18 {dimension_numbers = #tpu.dot_dimension_numbers<[1], [0], [0], [1], [0, 0, 1, 1], [], []>} : vector<8x32xbf16>, vector<32x16xbf16>, vector<8x16xf32> -> vector<8x16xf32>
    %c0_19 = arith.constant 0 : index
    %c0_20 = arith.constant 0 : index
    %38 = vector.load %arg9[%c0_19, %c0_20] : memref<1x16xf32, #tpu.memory_space<vmem>>, vector<1x16xf32>
    %39 = vector.broadcast %38 : vector<1x16xf32> to vector<8x16xf32>
    %40 = arith.addf %37, %39 : vector<8x16xf32>
    %c0_21 = arith.constant 0 : index
    %c0_22 = arith.constant 0 : index
    %41 = vector.load %arg1[%c0_21, %c0_22] : memref<8x8xf32, #tpu.memory_space<vmem>>, vector<8x8xf32>
    %c0_23 = arith.constant 0 : index
    %c0_24 = arith.constant 0 : index
    %42 = vector.load %arg3[%c0_23, %c0_24] : memref<8x16xf32, #tpu.memory_space<vmem>>, vector<8x16xf32>
    %43 = arith.truncf %41 : vector<8x8xf32> to vector<8x8xbf16>
    %c0_25 = arith.constant 0 : index
    %c0_26 = arith.constant 0 : index
    %44 = vector.load %arg10[%c0_25, %c0_26] : memref<8x256xbf16, #tpu.memory_space<vmem>>, vector<8x256xbf16>
    %cst_27 = arith.constant dense<0.000000e+00> : vector<8x256xf32>
    %45 = tpu.matmul %43, %44, %cst_27 {dimension_numbers = #tpu.dot_dimension_numbers<[1], [0], [0], [1], [0, 0, 1, 1], [], []>} : vector<8x8xbf16>, vector<8x256xbf16>, vector<8x256xf32> -> vector<8x256xf32>
    %46 = arith.truncf %40 : vector<8x16xf32> to vector<8x16xbf16>
    %c0_28 = arith.constant 0 : index
    %c0_29 = arith.constant 0 : index
    %47 = vector.load %arg11[%c0_28, %c0_29] : memref<16x256xbf16, #tpu.memory_space<vmem>>, vector<16x256xbf16>
    %cst_30 = arith.constant dense<0.000000e+00> : vector<8x256xf32>
    %48 = tpu.matmul %46, %47, %cst_30 {dimension_numbers = #tpu.dot_dimension_numbers<[1], [0], [0], [1], [0, 0, 1, 1], [], []>} : vector<8x16xbf16>, vector<16x256xbf16>, vector<8x256xf32> -> vector<8x256xf32>
    %49 = arith.addf %45, %48 : vector<8x256xf32>
    %50 = arith.truncf %42 : vector<8x16xf32> to vector<8x16xbf16>
    %c0_31 = arith.constant 0 : index
    %c0_32 = arith.constant 0 : index
    %51 = vector.load %arg12[%c0_31, %c0_32] : memref<16x256xbf16, #tpu.memory_space<vmem>>, vector<16x256xbf16>
    %cst_33 = arith.constant dense<0.000000e+00> : vector<8x256xf32>
    %52 = tpu.matmul %50, %51, %cst_33 {dimension_numbers = #tpu.dot_dimension_numbers<[1], [0], [0], [1], [0, 0, 1, 1], [], []>} : vector<8x16xbf16>, vector<16x256xbf16>, vector<8x256xf32> -> vector<8x256xf32>
    %53 = arith.addf %49, %52 : vector<8x256xf32>
    %c0_34 = arith.constant 0 : index
    %c0_35 = arith.constant 0 : index
    %54 = vector.load %arg13[%c0_34, %c0_35] : memref<1x256xf32, #tpu.memory_space<vmem>>, vector<1x256xf32>
    %55 = vector.broadcast %54 : vector<1x256xf32> to vector<8x256xf32>
    %56 = arith.addf %53, %55 : vector<8x256xf32>
    %cst_36 = arith.constant 2.000000e+01 : f32
    %57 = vector.broadcast %cst_36 : f32 to vector<8x256xf32>
    %58 = arith.minimumf %56, %57 : vector<8x256xf32>
    %59 = math.exp %58 : vector<8x256xf32>
    %cst_37 = arith.constant 1.000000e+00 : f32
    %60 = vector.broadcast %cst_37 : f32 to vector<8x256xf32>
    %61 = arith.addf %60, %59 : vector<8x256xf32>
    %cst_38 = arith.constant 1.000000e+00 : f32
    %62 = vector.broadcast %cst_38 : f32 to vector<8x256xf32>
    %63 = arith.addf %62, %59 : vector<8x256xf32>
    %64 = arith.mulf %61, %63 : vector<8x256xf32>
    %cst_39 = arith.constant 1.000000e+00 : f32
    %65 = vector.broadcast %cst_39 : f32 to vector<8x256xf32>
    %66 = arith.subf %64, %65 : vector<8x256xf32>
    %cst_40 = arith.constant 1.000000e+00 : f32
    %67 = vector.broadcast %cst_40 : f32 to vector<8x256xf32>
    %68 = arith.addf %64, %67 : vector<8x256xf32>
    %69 = tpu.reciprocal %68 {approx = true} : vector<8x256xf32> -> vector<8x256xf32>
    %70 = arith.mulf %66, %69 : vector<8x256xf32>
    %cst_41 = arith.constant 2.000000e+01 : f32
    %71 = vector.broadcast %cst_41 : f32 to vector<8x256xf32>
    %72 = arith.cmpf ogt, %56, %71 : vector<8x256xf32>
    %73 = arith.mulf %56, %70 : vector<8x256xf32>
    %74 = arith.select %72, %56, %73 : vector<8x256xi1>, vector<8x256xf32>
    %75 = arith.truncf %74 : vector<8x256xf32> to vector<8x256xbf16>
    %c0_42 = arith.constant 0 : index
    %c0_43 = arith.constant 0 : index
    %76 = vector.load %arg14[%c0_42, %c0_43] : memref<256x256xbf16, #tpu.memory_space<vmem>>, vector<256x256xbf16>
    %cst_44 = arith.constant dense<0.000000e+00> : vector<8x256xf32>
    %77 = tpu.matmul %75, %76, %cst_44 {dimension_numbers = #tpu.dot_dimension_numbers<[1], [0], [0], [1], [0, 0, 1, 1], [], []>} : vector<8x256xbf16>, vector<256x256xbf16>, vector<8x256xf32> -> vector<8x256xf32>
    %c0_45 = arith.constant 0 : index
    %c0_46 = arith.constant 0 : index
    %78 = vector.load %arg15[%c0_45, %c0_46] : memref<1x256xf32, #tpu.memory_space<vmem>>, vector<1x256xf32>
    %79 = vector.broadcast %78 : vector<1x256xf32> to vector<8x256xf32>
    %80 = arith.addf %77, %79 : vector<8x256xf32>
    %cst_47 = arith.constant 2.000000e+01 : f32
    %81 = vector.broadcast %cst_47 : f32 to vector<8x256xf32>
    %82 = arith.minimumf %80, %81 : vector<8x256xf32>
    %83 = math.exp %82 : vector<8x256xf32>
    %cst_48 = arith.constant 1.000000e+00 : f32
    %84 = vector.broadcast %cst_48 : f32 to vector<8x256xf32>
    %85 = arith.addf %84, %83 : vector<8x256xf32>
    %cst_49 = arith.constant 1.000000e+00 : f32
    %86 = vector.broadcast %cst_49 : f32 to vector<8x256xf32>
    %87 = arith.addf %86, %83 : vector<8x256xf32>
    %88 = arith.mulf %85, %87 : vector<8x256xf32>
    %cst_50 = arith.constant 1.000000e+00 : f32
    %89 = vector.broadcast %cst_50 : f32 to vector<8x256xf32>
    %90 = arith.subf %88, %89 : vector<8x256xf32>
    %cst_51 = arith.constant 1.000000e+00 : f32
    %91 = vector.broadcast %cst_51 : f32 to vector<8x256xf32>
    %92 = arith.addf %88, %91 : vector<8x256xf32>
    %93 = tpu.reciprocal %92 {approx = true} : vector<8x256xf32> -> vector<8x256xf32>
    %94 = arith.mulf %90, %93 : vector<8x256xf32>
    %cst_52 = arith.constant 2.000000e+01 : f32
    %95 = vector.broadcast %cst_52 : f32 to vector<8x256xf32>
    %96 = arith.cmpf ogt, %80, %95 : vector<8x256xf32>
    %97 = arith.mulf %80, %94 : vector<8x256xf32>
    %98 = arith.select %96, %80, %97 : vector<8x256xi1>, vector<8x256xf32>
    %99 = arith.truncf %98 : vector<8x256xf32> to vector<8x256xbf16>
    %c0_53 = arith.constant 0 : index
    %c0_54 = arith.constant 0 : index
    %100 = vector.load %arg16[%c0_53, %c0_54] : memref<256x256xbf16, #tpu.memory_space<vmem>>, vector<256x256xbf16>
    %cst_55 = arith.constant dense<0.000000e+00> : vector<8x256xf32>
    %101 = tpu.matmul %99, %100, %cst_55 {dimension_numbers = #tpu.dot_dimension_numbers<[1], [0], [0], [1], [0, 0, 1, 1], [], []>} : vector<8x256xbf16>, vector<256x256xbf16>, vector<8x256xf32> -> vector<8x256xf32>
    %c0_56 = arith.constant 0 : index
    %c0_57 = arith.constant 0 : index
    %102 = vector.load %arg17[%c0_56, %c0_57] : memref<1x256xf32, #tpu.memory_space<vmem>>, vector<1x256xf32>
    %103 = vector.broadcast %102 : vector<1x256xf32> to vector<8x256xf32>
    %104 = arith.addf %101, %103 : vector<8x256xf32>
    %cst_58 = arith.constant 2.000000e+01 : f32
    %105 = vector.broadcast %cst_58 : f32 to vector<8x256xf32>
    %106 = arith.minimumf %104, %105 : vector<8x256xf32>
    %107 = math.exp %106 : vector<8x256xf32>
    %cst_59 = arith.constant 1.000000e+00 : f32
    %108 = vector.broadcast %cst_59 : f32 to vector<8x256xf32>
    %109 = arith.addf %108, %107 : vector<8x256xf32>
    %cst_60 = arith.constant 1.000000e+00 : f32
    %110 = vector.broadcast %cst_60 : f32 to vector<8x256xf32>
    %111 = arith.addf %110, %107 : vector<8x256xf32>
    %112 = arith.mulf %109, %111 : vector<8x256xf32>
    %cst_61 = arith.constant 1.000000e+00 : f32
    %113 = vector.broadcast %cst_61 : f32 to vector<8x256xf32>
    %114 = arith.subf %112, %113 : vector<8x256xf32>
    %cst_62 = arith.constant 1.000000e+00 : f32
    %115 = vector.broadcast %cst_62 : f32 to vector<8x256xf32>
    %116 = arith.addf %112, %115 : vector<8x256xf32>
    %117 = tpu.reciprocal %116 {approx = true} : vector<8x256xf32> -> vector<8x256xf32>
    %118 = arith.mulf %114, %117 : vector<8x256xf32>
    %cst_63 = arith.constant 2.000000e+01 : f32
    %119 = vector.broadcast %cst_63 : f32 to vector<8x256xf32>
    %120 = arith.cmpf ogt, %104, %119 : vector<8x256xf32>
    %121 = arith.mulf %104, %118 : vector<8x256xf32>
    %122 = arith.select %120, %104, %121 : vector<8x256xi1>, vector<8x256xf32>
    %123 = arith.truncf %122 : vector<8x256xf32> to vector<8x256xbf16>
    %c0_64 = arith.constant 0 : index
    %c0_65 = arith.constant 0 : index
    %124 = vector.load %arg18[%c0_64, %c0_65] : memref<256x128xbf16, #tpu.memory_space<vmem>>, vector<256x128xbf16>
    %cst_66 = arith.constant dense<0.000000e+00> : vector<8x128xf32>
    %125 = tpu.matmul %123, %124, %cst_66 {dimension_numbers = #tpu.dot_dimension_numbers<[1], [0], [0], [1], [0, 0, 1, 1], [], []>} : vector<8x256xbf16>, vector<256x128xbf16>, vector<8x128xf32> -> vector<8x128xf32>
    %c0_67 = arith.constant 0 : index
    %c0_68 = arith.constant 0 : index
    %126 = vector.load %arg19[%c0_67, %c0_68] : memref<1x128xf32, #tpu.memory_space<vmem>>, vector<1x128xf32>
    %127 = vector.broadcast %126 : vector<1x128xf32> to vector<8x128xf32>
    %128 = arith.addf %125, %127 : vector<8x128xf32>
    %c0_69 = arith.constant 0 : index
    %c0_70 = arith.constant 0 : index
    %129 = vector.load %arg20[%c0_69, %c0_70] : memref<8x128xf32, #tpu.memory_space<vmem>>, vector<8x128xf32>
    tpu.vector_store %arg20[%c0_69, %c0_70], %128 {strides = array<i32>} : memref<8x128xf32, #tpu.memory_space<vmem>>, vector<8x128xf32>,
    return
  }
  func.func @transform_0(%arg0: i32) -> (i32, i32) {
    %c0_i32 = arith.constant 0 : i32
    %c0_i32_0 = arith.constant 0 : i32
    return %arg0, %c0_i32 : i32, i32
  }
  func.func @transform_1(%arg0: i32) -> (i32, i32) {
    %c0_i32 = arith.constant 0 : i32
    %c0_i32_0 = arith.constant 0 : i32
    return %arg0, %c0_i32 : i32, i32
  }
  func.func @transform_2(%arg0: i32) -> (i32, i32) {
    %c0_i32 = arith.constant 0 : i32
    %c0_i32_0 = arith.constant 0 : i32
    return %arg0, %c0_i32 : i32, i32
  }
  func.func @transform_3(%arg0: i32) -> (i32, i32) {
    %c0_i32 = arith.constant 0 : i32
    %c0_i32_0 = arith.constant 0 : i32
    %c0_i32_1 = arith.constant 0 : i32
    return %c0_i32, %c0_i32_0 : i32, i32
  }
  func.func @transform_4(%arg0: i32) -> (i32, i32) {
    %c0_i32 = arith.constant 0 : i32
    %c0_i32_0 = arith.constant 0 : i32
    %c0_i32_1 = arith.constant 0 : i32
    return %c0_i32, %c0_i32_0 : i32, i32
  }
  func.func @transform_5(%arg0: i32) -> (i32, i32) {
    %c0_i32 = arith.constant 0 : i32
    %c0_i32_0 = arith.constant 0 : i32
    %c0_i32_1 = arith.constant 0 : i32
    return %c0_i32, %c0_i32_0 : i32, i32
  }
  func.func @transform_6(%arg0: i32) -> (i32, i32) {
    %c0_i32 = arith.constant 0 : i32
    %c0_i32_0 = arith.constant 0 : i32
    %c0_i32_1 = arith.constant 0 : i32
    return %c0_i32, %c0_i32_0 : i32, i32
  }
  func.func @transform_7(%arg0: i32) -> (i32, i32) {
    %c0_i32 = arith.constant 0 : i32
    %c0_i32_0 = arith.constant 0 : i32
    %c0_i32_1 = arith.constant 0 : i32
    return %c0_i32, %c0_i32_0 : i32, i32
  }
  func.func @transform_8(%arg0: i32) -> (i32, i32) {
    %c0_i32 = arith.constant 0 : i32
    %c0_i32_0 = arith.constant 0 : i32
    %c0_i32_1 = arith.constant 0 : i32
    return %c0_i32, %c0_i32_0 : i32, i32
  }
  func.func @transform_9(%arg0: i32) -> (i32, i32) {
    %c0_i32 = arith.constant 0 : i32
    %c0_i32_0 = arith.constant 0 : i32
    %c0_i32_1 = arith.constant 0 : i32
    return %c0_i32, %c0_i32_0 : i32, i32
  }
  func.func @transform_10(%arg0: i32) -> (i32, i32) {
    %c0_i32 = arith.constant 0 : i32
    %c0_i32_0 = arith.constant 0 : i32
    %c0_i32_1 = arith.constant 0 : i32
    return %c0_i32, %c0_i32_0 : i32, i32
  }
  func.func @transform_11(%arg0: i32) -> (i32, i32) {
    %c0_i32 = arith.constant 0 : i32
    %c0_i32_0 = arith.constant 0 : i32
    %c0_i32_1 = arith.constant 0 : i32
    return %c0_i32, %c0_i32_0 : i32, i32
  }
  func.func @transform_12(%arg0: i32) -> (i32, i32) {
    %c0_i32 = arith.constant 0 : i32
    %c0_i32_0 = arith.constant 0 : i32
    %c0_i32_1 = arith.constant 0 : i32
    return %c0_i32, %c0_i32_0 : i32, i32
  }
  func.func @transform_13(%arg0: i32) -> (i32, i32) {
    %c0_i32 = arith.constant 0 : i32
    %c0_i32_0 = arith.constant 0 : i32
    %c0_i32_1 = arith.constant 0 : i32
    return %c0_i32, %c0_i32_0 : i32, i32
  }
  func.func @transform_14(%arg0: i32) -> (i32, i32) {
    %c0_i32 = arith.constant 0 : i32
    %c0_i32_0 = arith.constant 0 : i32
    %c0_i32_1 = arith.constant 0 : i32
    return %c0_i32, %c0_i32_0 : i32, i32
  }
  func.func @transform_15(%arg0: i32) -> (i32, i32) {
    %c0_i32 = arith.constant 0 : i32
    %c0_i32_0 = arith.constant 0 : i32
    %c0_i32_1 = arith.constant 0 : i32
    return %c0_i32, %c0_i32_0 : i32, i32
  }
  func.func @transform_16(%arg0: i32) -> (i32, i32) {
    %c0_i32 = arith.constant 0 : i32
    %c0_i32_0 = arith.constant 0 : i32
    %c0_i32_1 = arith.constant 0 : i32
    return %c0_i32, %c0_i32_0 : i32, i32
  }
  func.func @transform_17(%arg0: i32) -> (i32, i32) {
    %c0_i32 = arith.constant 0 : i32
    %c0_i32_0 = arith.constant 0 : i32
    %c0_i32_1 = arith.constant 0 : i32
    return %c0_i32, %c0_i32_0 : i32, i32
  }
  func.func @transform_18(%arg0: i32) -> (i32, i32) {
    %c0_i32 = arith.constant 0 : i32
    %c0_i32_0 = arith.constant 0 : i32
    %c0_i32_1 = arith.constant 0 : i32
    return %c0_i32, %c0_i32_0 : i32, i32
  }
  func.func @transform_19(%arg0: i32) -> (i32, i32) {
    %c0_i32 = arith.constant 0 : i32
    %c0_i32_0 = arith.constant 0 : i32
    return %arg0, %c0_i32 : i32, i32
  }
}

</mosaic_0001>

<bundles_post_ra>
// kernel: mlp_forward.1
= control target key start
LH: loop header
LB: loop body
LE: loop exit
PB: predicated region body
PF: predicated region fallthrough
CT: control target
= control target key end

     0   :  { %s2601_s0 = inlined_call_operand.vmem [shape: f32[8,8], index: 0, kind: input, shape index: {}]   ;;  %s2602_s1 = inlined_call_operand.vmem [shape: f32[8,1], index: 1, kind: input, shape index: {}]   ;;  %s2603_s2 = inlined_call_operand.vmem [shape: f32[8,16], index: 2, kind: input, shape index: {}]   ;;  %s2604_s3 = inlined_call_operand.vmem [shape: f32[1,8], index: 3, kind: input, shape index: {}]   ;;  %s2605_s4 = inlined_call_operand.vmem [shape: bf16[8,32], index: 4, kind: input, shape index: {}]   ;;  %s2606_s5 = inlined_call_operand.vmem [shape: bf16[8,32], index: 5, kind: input, shape index: {}]   ;;  %s2607_s6 = inlined_call_operand.vmem [shape: f32[1,32], index: 6, kind: input, shape index: {}]   ;;  %s2608_s7 = inlined_call_operand.vmem [shape: bf16[32,16], index: 7, kind: input, shape index: {}]   ;;  %s2609_s8 = inlined_call_operand.vmem [shape: f32[1,16], index: 8, kind: input, shape index: {}]   ;;  %s2610_s9 = inlined_call_operand.vmem [shape: bf16[8,256], index: 9, kind: input, shape index: {}]   ;;  %s2611_s10 = inlined_call_operand.vmem [shape: bf16[16,256], index: 10, kind: input, shape index: {}]   ;;  %s2612_s11 = inlined_call_operand.vmem [shape: bf16[16,256], index: 11, kind: input, shape index: {}]   ;;  %s2613_s12 = inlined_call_operand.vmem [shape: f32[1,256], index: 12, kind: input, shape index: {}]   ;;  %s2614_s13 = inlined_call_operand.vmem [shape: bf16[256,256], index: 13, kind: input, shape index: {}]   ;;  %s2615_s14 = inlined_call_operand.vmem [shape: f32[1,256], index: 14, kind: input, shape index: {}]   ;;  %s2616_s15 = inlined_call_operand.vmem [shape: bf16[256,256], index: 15, kind: input, shape index: {}]   ;;  %s2617_s16 = inlined_call_operand.vmem [shape: f32[1,256], index: 16, kind: input, shape index: {}]   ;;  %s2618_s17 = inlined_call_operand.vmem [shape: bf16[256,128], index: 17, kind: input, shape index: {}]   ;;  %s2619_s18 = inlined_call_operand.vmem [shape: f32[1,128], index: 18, kind: input, shape index: {}]   ;;  %s2620_s19 = inlined_call_operand.hbm [shape: f32[8,128], index: 19, kind: output, shape index: {}]  }
   0x1   :  { %2621 = sst [smem:[#allocation5_spill]] %s2601_s0 }
   0x2   :  { %2622 = sst [smem:[#allocation6_spill]] %s2602_s1 }
   0x3   :  { %2623 = sst [smem:[#allocation7_spill]] %s2603_s2 }
   0x4   :  { %2624 = sst [smem:[#allocation8_spill]] %s2604_s3 }
   0x5   :  { %s2625_s20 = sld [smem:[#allocation6_spill]]  ;;  %v1894_v1 = vmov 0  }
   0x6   :  { %1835 = vset.pattern.permute.xlu0 %v1894_v1 }
   0xb   :  { %v64_v0 = vld [vmem:[%s2625_s20] sm:$0xff] }
   0xc   :  { %68 = vperm.xlu0 %1835, %v64_v0  }
   0xd   :  { %24 = vsyncpa [#allocation3], 0  ;;  %s2626_s22 = sld [smem:[#allocation8_spill]]  ;;  %v387_v5 = vld [vmem:[%s2606_s5] sm:$0xf]  ;;  %vm392_vm0 = vcmask 1043456  }
   0xe   :  { %v385_v6 = vld [vmem:[%s2605_s4] sm:$0xf]  ;;  %v394_v7 = vsel %vm392_vm0, %v387_v5, 0  ;;  %v1895_v20 = vmov 683565275   ;;  %s2627_s3 = sld [smem:[#allocation7_spill]] }
   0xf   :  { %v413_v8 = vsel %vm392_vm0, %v385_v6, 0  ;;  %403 = vmatpush.bf16.msra.mxu0 %v394_v7  ;;  %v1896_v22 = vmov 2475754826   ;;  %v1897_v25 = vmov 2131351028   ;;  %s2628_s28 = sld [smem:[#allocation5_spill]] }
  0x10   :  { %422 = vmatpush.bf16.msra.mxu2 %v413_v8  ;;  %v1898_v28 = vmov 2102212464   ;;  %v1899_v31 = vmov 920167782   ;;  %v1900_v34 = vmov 1326507024  }
  0x11   :  { %s1901_s30 = smov [#allocation2]  }
  0x12   :  { %s1364_s20 = sshll.u32 %s1901_s30, 4  ;;  %s1365_s20 = int_to_ptr.vmem [resolvable:$true] %s1364_s20 }
  0x13   :  { %v1836_v2 = vld [vmem:[%s2626_s22] ss:$0 sm:$0xff] }
  0x7e   :  { %v69_v3 = vpop.permute.xlu0 %68 }
  0x7f   :  { %v2009_v4 = vmul.f32 %v1836_v2, %v69_v3 }
  0x81   :  { %v78_v9 = vand.u32 2139095040, %v2009_v4  ;;  %v75_v12 = vand.u32 2147483647, %v2009_v4  ;;  %vm77_vm13 = vcmp.lt.s32.totalorder %v2009_v4, 0 }
  0x83   :  { %v79_v10 = vshrl.u32 %v78_v9, 23  ;;  %v82_v14 = vand.u32 8388607, %v75_v12  ;;  %vm76_vm14 = vcmp.le.f32.partialorder %v75_v12, 0.7853982 }
  0x85   :  { %v1375_v11 = vadd.s32 4294967169, %v79_v10  ;;  %v83_v18 = vor.u32 8388608, %v82_v14 }
  0x87   :  { %v85_v13 = vadd.s32 1, %v1375_v11  ;;  %v2034_v41 = vshll.u32 %v83_v18, 8 }
  0x89   :  { %vm86_vm1 = vcmp.gt.s32.totalorder %v85_v13, 0  ;;  %v124_v50 = vand.u32 65535, %v2034_v41  ;;  %v125_v51 = vshrl.u32 %v2034_v41, 16 }
  0x8a   :  { %v87_v15 = vsel %vm86_vm1, %v85_v13, 0 }
  0x8b   :  { %v89_v16 = vand.u32 31, %v87_v15  ;;  %v2025_v19 = vshrl.u32 %v87_v15, 5 }
  0x8d   :  { %v2023_v17 = vsub.s32 32, %v89_v16  ;;  %v92_v21 = vshll.u32 %v1895_v20, %v89_v16  ;;  %v95_v23 = vshll.u32 %v1896_v22, %v89_v16  ;;  %v98_v27 = vshll.u32 %v1897_v25, %v89_v16 }
  0x8e   :  { %v101_v30 = vshll.u32 %v1898_v28, %v89_v16  ;;  %v104_v33 = vshll.u32 %v1899_v31, %v89_v16  ;;  %vm107_vm2 = vcmp.lt.s32.totalorder %v2025_v19, 1  ;;  %vm110_vm3 = vcmp.lt.s32.totalorder %v2025_v19, 4 }
  0x8f   :  { %v93_v24 = vshrl.u32 %v1896_v22, %v2023_v17  ;;  %v96_v26 = vshrl.u32 %v1897_v25, %v2023_v17  ;;  %v99_v29 = vshrl.u32 %v1898_v28, %v2023_v17  ;;  %v102_v32 = vshrl.u32 %v1899_v31, %v2023_v17 }
  0x90   :  { %v105_v35 = vshrl.u32 %v1900_v34, %v2023_v17  ;;  %vm109_vm4 = vcmp.lt.s32.totalorder %v2025_v19, 3  ;;  %vm108_vm5 = vcmp.lt.s32.totalorder %v2025_v19, 2  ;;  %v91_v15 = vshrl.u32 %v1895_v20, %v2023_v17 }
  0x91   :  { %v94_v36 = vor.u32 %v93_v24, %v92_v21  ;;  %v97_v37 = vor.u32 %v96_v26, %v95_v23  ;;  %v100_v38 = vor.u32 %v99_v29, %v98_v27  ;;  %v103_v39 = vor.u32 %v102_v32, %v101_v30 }
  0x92   :  { %v106_v40 = vor.u32 %v105_v35, %v104_v33 }
  0x93   :  { %v115_v42 = vsel %vm107_vm2, %v94_v36, %v97_v37  ;;  %v119_v43 = vsel %vm107_vm2, %v97_v37, %v100_v38  ;;  %v116_v44 = vsel %vm110_vm3, %v103_v39, 920167782  ;;  %v112_v11 = vsel %vm110_vm3, %v100_v38, 2102212464 }
  0x94   :  { %v120_v45 = vsel %vm110_vm3, %v106_v40, 1326507024  ;;  %v117_v46 = vsel %vm109_vm4, %v100_v38, %v116_v44  ;;  %v111_v24 = vsel %vm107_vm2, %v91_v15, %v94_v36  ;;  %v113_v25 = vsel %vm109_vm4, %v97_v37, %v112_v11 }
  0x95   :  { %v121_v47 = vsel %vm109_vm4, %v103_v39, %v120_v45  ;;  %v118_v48 = vsel %vm108_vm5, %v115_v42, %v117_v46  ;;  %v114_v17 = vsel %vm108_vm5, %v111_v24, %v113_v25 }
  0x96   :  { %v122_v49 = vsel %vm108_vm5, %v119_v43, %v121_v47  ;;  %v148_v54 = vand.u32 65535, %v118_v48  ;;  %v149_v55 = vshrl.u32 %v118_v48, 16  ;;  %v168_v32 = vmul.u32 %v2034_v41, %v114_v17  ;;  %v1742_v17 = vld [vmem:[%s2608_s7 + $0x8] sm:$0xff] }
  0x97   :  { %v126_v52 = vand.u32 65535, %v122_v49  ;;  %v127_v53 = vshrl.u32 %v122_v49, 16  ;;  %476 = vmatpush.bf16.msrb.mxu2 %v1742_v17  ;;  %v1459_v17 = vld [vmem:[%s2614_s13 + $0x50] sm:$0xf] }
  0x98   :  { %v151_v58 = vmul.u32 %v149_v55, %v124_v50  ;;  %v152_v59 = vmul.u32 %v148_v54, %v125_v51  ;;  %v150_v63 = vmul.u32 %v148_v54, %v124_v50  ;;  %v153_v5 = vmul.u32 %v149_v55, %v125_v51 }
  0x99   :  { %v129_v56 = vmul.u32 %v127_v53, %v124_v50  ;;  %v130_v57 = vmul.u32 %v126_v52, %v125_v51  ;;  %v128_v60 = vmul.u32 %v126_v52, %v124_v50  ;;  %v131_v62 = vmul.u32 %v127_v53, %v125_v51 }
  0x9a   :  { %v154_v0 = vshll.u32 %v151_v58, 16  ;;  %v156_v7 = vshll.u32 %v152_v59, 16  ;;  %v155_v22 = vshrl.u32 %v151_v58, 16  ;;  %v157_v28 = vshrl.u32 %v152_v59, 16 }
  0x9b   :  { %v132_v61 = vshll.u32 %v129_v56, 16  ;;  %v134_v2 = vshll.u32 %v130_v57, 16  ;;  %v133_v16 = vshrl.u32 %v129_v56, 16  ;;  %v135_v26 = vshrl.u32 %v130_v57, 16 }
  0x9c   :  { %vm158_vm7 = vc.u32 %v150_v63, %v154_v0  ;;  %v160_v8 = vadd.s32 %v154_v0, %v150_v63 }
  0x9d   :  { %vm136_vm6 = vc.u32 %v128_v60, %v132_v61  ;;  %v138_v3 = vadd.s32 %v132_v61, %v128_v60  ;;  %v159_v10 = vsel %vm158_vm7, 1, %v1894_v1  ;;  %vm388_vm7 = vcmask 64512  }
  0x9e   :  { %v137_v6 = vsel %vm136_vm6, 1, %v1894_v1  ;;  %v161_v14 = vadd.s32 %v159_v10, %v153_v5  ;;  %vm162_vm9 = vc.u32 %v160_v8, %v156_v7  ;;  %v164_v31 = vadd.s32 %v160_v8, %v156_v7 }
  0x9f   :  { %v139_v9 = vadd.s32 %v137_v6, %v131_v62  ;;  %vm140_vm8 = vc.u32 %v138_v3, %v134_v2  ;;  %v163_v21 = vsel %vm162_vm9, 1, %v1894_v1  ;;  %vm218_vm6 = vweird.f32 %v2009_v4 }
  0xa0   :  { %v141_v13 = vsel %vm140_vm8, 1, %v1894_v1  ;;  %v165_v23 = vadd.s32 %v163_v21, %v161_v14  ;;  %vm466_vm9 = vcmask 261120  }
  0xa1   :  { %v143_v18 = vadd.s32 %v141_v13, %v139_v9 }
  0xa2   :  { %v166_v29 = vadd.s32 %v165_v23, %v155_v22 }
  0xa3   :  { %v144_v27 = vadd.s32 %v143_v18, %v133_v16 }
  0xa4   :  { %v167_v20 = vadd.s32 %v166_v29, %v157_v28 }
  0xa5   :  { %v145_v30 = vadd.s32 %v144_v27, %v135_v26 }
  0xa6   :  { %v171_v1 = vadd.s32 1, %v167_v20 }
  0xa7   :  { %vm170_vm10 = vc.u32 %v145_v30, %v164_v31  ;;  %v169_v19 = vadd.s32 %v164_v31, %v145_v30 }
  0xa8   :  { %v172_v33 = vsel %vm170_vm10, %v171_v1, %v167_v20  ;;  %v1741_v20 = vld [vmem:[%s2608_s7] sm:$0xff]  ;;  %vm500_vm10 = vcmask 130048   ;;  %s1366_s7 = sshll.u32 %s2620_s19, 4  ;;  %s1367_s7 = int_to_ptr.hbm [resolvable:$true] %s1366_s7 }
  0xa9   :  { %v173_v34 = vadd.s32 %v172_v33, %v168_v32  ;;  %477 = vmatpush.bf16.msrb.mxu2 %v1741_v20  ;;  %v1757_v20 = vld [vmem:[%s2614_s13 + $0x54] sm:$0xf] }
  0xab   :  { %v174_v35 = vadd.s32 536870912, %v173_v34 }
  0xad   :  { %v175_v36 = vshrl.u32 %v174_v35, 30  ;;  %v1743_v35 = vld [vmem:[%s2611_s10 + $0x4] sm:$0xf] }
  0xaf   :  { %v176_v38 = vshll.u32 %v175_v36, 30  ;;  %v199_v57 = vsub.s32 4, %v175_v36 }
  0xb1   :  { %v177_v37 = vsub.s32 %v173_v34, %v176_v38  ;;  %v200_v62 = vsel %vm77_vm13, %v199_v57, %v175_v36  ;;  %v1397_v36 = vld [vmem:[%s2611_s10 + $0x8] sm:$0xf0] }
  0xb2   :  { %v202_v2 = vsel %vm76_vm14, 0, %v200_v62 }
  0xb3   :  { %vm178_vm11 = vcmp.lt.s32.totalorder %v177_v37, 0  ;;  %v179_v39 = vsub.s32 0, %v177_v37  ;;  %v219_v8 = vadd.s32 3, %v202_v2  ;;  %v374_v13 = vand.u32 3, %v202_v2  ;;  %v1745_v2 = vld [vmem:[%s2612_s11 + $0x4] sm:$0xf] }
  0xb5   :  { %v180_v40 = vsel %vm178_vm11, %v179_v39, %v177_v37  ;;  %v220_v14 = vand.u32 3, %v219_v8  ;;  %vm375_vm15 = vcmp.lt.s32.totalorder %v374_v13, 2  ;;  %vm376_vm1 = vcmp.eq.s32.totalorder %v374_v13, 0  ;;  %v1838_v8 = vld [vmem:[%s2609_s8] ss:$0 sm:$0xff] }
  0xb6   :  { %v181_v42 = vclz %v180_v40  ;;  %vm379_vm2 = vcmp.eq.s32.totalorder %v374_v13, 2 }
  0xb7   :  { %vm221_vm3 = vcmp.lt.s32.totalorder %v220_v14, 2  ;;  %vm222_vm4 = vcmp.eq.s32.totalorder %v220_v14, 0  ;;  %vm225_vm5 = vcmp.eq.s32.totalorder %v220_v14, 2 }
  0xb8   :  { %v1376_v43 = vadd.s32 4294967294, %v181_v42 }
  0xba   :  { %vm1377_vm12 = vcmp.lt.s32.totalorder %v1376_v43, 0 }
  0xbb   :  { %v184_v44 = vsel %vm1377_vm12, 0, %v1376_v43 }
  0xbc   :  { %v185_v45 = vsub.s32 32, %v184_v44  ;;  %v189_v46 = vsub.s32 4294967266, %v184_v44  ;;  %v186_v47 = vshll.u32 %v177_v37, %v184_v44  ;;  %v1400_v37 = vor.u32 %v1743_v35, %v1397_v36  ;;  %v1756_v35 = vld [vmem:[%s2614_s13 + $0x44] sm:$0xf0]  ;;  %v1755_v36 = vld [vmem:[%s2614_s13 + $0x44] sm:$0xf] }
  0xbe   :  { %v187_v48 = vshrl.u32 %v169_v19, %v185_v45  ;;  %v190_v49 = vadd.s32 127, %v189_v46  ;;  %524 = vmatpush.bf16.msrb.mxu0 %v1400_v37  ;;  %v1453_v37 = vld [vmem:[%s2614_s13 + $0x48] sm:$0xf0] }
  0xc0   :  { %v188_v41 = vor.u32 %v187_v48, %v186_v47  ;;  %v191_v50 = vshll.u32 %v190_v49, 23 }
  0xc2   :  { %v192_v51 = vor.u32 4788187, %v191_v50  ;;  %v195_v53 = vcvt.s32.f32 %v188_v41  ;;  %v1395_v50 = vld [vmem:[%s2611_s10] sm:$0xf] }
  0xc4   :  { %v193_v52 = vand.u32 2147483647, %v192_v51  ;;  %v1744_v51 = vld [vmem:[%s2611_s10 + $0x4] sm:$0xf0] }
  0xc6   :  { %v196_v54 = vmul.f32 %v195_v53, %v193_v52  ;;  %v1396_v52 = vor.u32 %v1744_v51, %v1395_v50  ;;  %v1407_v53 = vld [vmem:[%s2612_s11] sm:$0xf] }
  0xc7   :  { %v1435_v51 = vld [vmem:[%s2614_s13 + $0x20] sm:$0xf] }
  0xc8   :  { %v197_v55 = vxor.u32 2147483648, %v196_v54  ;;  %511 = vmatpush.bf16.msra.mxu3 %v1396_v52  ;;  %v1752_v52 = vld [vmem:[%s2614_s13 + $0x24] sm:$0xf0] }
  0xca   :  { %v198_v56 = vsel %vm77_vm13, %v197_v55, %v196_v54  ;;  %v1746_v54 = vld [vmem:[%s2612_s11 + $0x4] sm:$0xf0] }
  0xcb   :  { %v201_v58 = vsel %vm76_vm14, %v2009_v4, %v198_v56  ;;  %v1837_v4 = vld [vmem:[%s2607_s6] ss:$0 sm:$0xff]  ;;  %v1408_v55 = vor.u32 %v1746_v54, %v1407_v53 }
  0xcc   :  { %v203_v59 = vmul.f32 %v201_v58, %v201_v58  ;;  %v486_v56 = vld [vmem:[%s2610_s9] sm:$0xff] }
  0xcd   :  { %v531_v57 = vunpack.c.l.b16 %v486_v56  ;;  %v1531_v53 = vld [vmem:[%s2614_s13 + $0xe0] sm:$0xf] }
  0xce   :  { %v204_v60 = vmul.f32 -0.001358992, %v203_v59  ;;  %v211_v61 = vmul.f32 -0.00019511016, %v203_v59 }
  0xd0   :  { %v205_v63 = vadd.f32 0.041655596, %v204_v60  ;;  %v212_v0 = vadd.f32 0.008332121, %v211_v61  ;;  %v533_v61 = vpack.c.b16 %v531_v57, %v531_v57  ;;  %v1751_v57 = vld [vmem:[%s2614_s13 + $0x24] sm:$0xf] }
  0xd2   :  { %v206_v3 = vmul.f32 %v205_v63, %v203_v59  ;;  %v213_v5 = vmul.f32 %v212_v0, %v203_v59  ;;  %v539_v63 = vsel %vm392_vm0, %v533_v61, 0  ;;  %v483_v0 = vld [vmem:[%s2628_s28] sm:$0xff] }
  0xd3   :  { %551 = vmatpush.bf16.msra.mxu1 %v539_v63  ;;  %v1775_v61 = vld [vmem:[%s2614_s13 + $0xe4] sm:$0xf]  ;;  %v2237_v63 = vld [vmem:[%s2613_s12] sm:$0x3] }
  0xd4   :  { %v207_v6 = vadd.f32 -0.4999988, %v206_v3  ;;  %v214_v7 = vadd.f32 -0.16666654, %v213_v5  ;;  %v1409_v3 = vld [vmem:[%s2612_s11 + $0x8] sm:$0xf0] }
  0xd6   :  { %v208_v9 = vmul.f32 %v207_v6, %v203_v59  ;;  %v215_v10 = vmul.f32 %v214_v7, %v203_v59  ;;  %v484_v59 = vld [vmem:[%s2627_s3] sm:$0xff]  ;;  %v485_v6 = vpack.c.bf16 %v483_v0, %v483_v0  ;;  %v1412_v7 = vor.u32 %v1745_v2, %v1409_v3  ;;  %v1427_v2 = vld [vmem:[%s2614_s13 + $0x10] sm:$0xf]  ;;  %v1750_v3 = vld [vmem:[%s2614_s13 + $0x14] sm:$0xf0] }
  0xd7   :  { %v570_v60 = vpack.c.bf16 %v484_v59, %v484_v59 }
  0xd8   :  { %v209_v11 = vadd.f32 1.0, %v208_v9  ;;  %v216_v12 = vadd.f32 1.0, %v215_v10  ;;  %1403 = vmatmul.msk.bf16.vlgmr.msra.gmra.mxu1 %vm388_vm7, %v485_v6 }
  0xda   :  { %v217_v15 = vmul.f32 %v216_v12, %v201_v58  ;;  %v226_v16 = vxor.u32 2147483648, %v209_v11  ;;  %v532_v58 = vunpack.c.h.b16 %v486_v56  ;;  %v1776_v56 = vld [vmem:[%s2614_s13 + $0xe4] sm:$0xf0] }
  0xdb   :  { %v1532_v59 = vor.u32 %v1776_v56, %v1531_v53  ;;  %v1483_v53 = vld [vmem:[%s2614_s13 + $0x80] sm:$0xf]  ;;  %v1763_v56 = vld [vmem:[%s2614_s13 + $0x84] sm:$0xf] }
  0xdc   :  { %v223_v18 = vxor.u32 2147483648, %v217_v15  ;;  %v381_v22 = vsel %vm379_vm2, %v226_v16, %v217_v15  ;;  %v227_v24 = vsel %vm225_vm5, %v226_v16, %v217_v15  ;;  %v534_v62 = vpack.c.b16 %v532_v58, %v532_v58  ;;  %v1475_v15 = vld [vmem:[%s2614_s13 + $0x70] sm:$0xf]  ;;  %v1762_v16 = vld [vmem:[%s2614_s13 + $0x74] sm:$0xf0] }
  0xdd   :  { %v1437_v58 = vld [vmem:[%s2614_s13 + $0x28] sm:$0xf0] }
  0xde   :  { %v378_v21 = vsel %vm376_vm1, %v209_v11, %v223_v18  ;;  %v224_v23 = vsel %vm222_vm4, %v209_v11, %v223_v18  ;;  %v542_v5 = vsel %vm392_vm0, %v534_v62, 0  ;;  %v1761_v18 = vld [vmem:[%s2614_s13 + $0x74] sm:$0xf]  ;;  %v1533_v62 = vld [vmem:[%s2614_s13 + $0xe8] sm:$0xf0] }
  0xdf   :  { %v382_v25 = vsel %vm375_vm15, %v378_v21, %v381_v22  ;;  %v228_v26 = vsel %vm221_vm3, %v224_v23, %v227_v24  ;;  %564 = vmatpush.bf16.msrb.mxu3 %v542_v5  ;;  %v1476_v21 = vor.u32 %v1762_v16, %v1475_v15  ;;  %v1477_v22 = vld [vmem:[%s2614_s13 + $0x78] sm:$0xf0]  ;;  %v1467_v24 = vld [vmem:[%s2614_s13 + $0x60] sm:$0xf]  ;;  %v1536_v0 = vor.u32 %v1775_v61, %v1533_v62  ;;  %v1523_v5 = vld [vmem:[%s2614_s13 + $0xd0] sm:$0xf] }
  0xe0   :  { %v383_v27 = vsel %vm218_vm6, nan, %v382_v25  ;;  %v229_v28 = vsel %vm218_vm6, nan, %v228_v26  ;;  %v1480_v23 = vor.u32 %v1761_v18, %v1477_v22  ;;  %v1760_v25 = vld [vmem:[%s2614_s13 + $0x64] sm:$0xf0]  ;;  %v1759_v26 = vld [vmem:[%s2614_s13 + $0x64] sm:$0xf] }
  0xe1   :  { %v386_v29 = vpack.c.bf16 %v383_v27, %v383_v27  ;;  %v384_v30 = vpack.c.bf16 %v229_v28, %v229_v28  ;;  %846 = vmatpush.bf16.msrb.mxu1 %v1476_v21  ;;  %v1468_v28 = vor.u32 %v1760_v25, %v1467_v24  ;;  %v1525_v15 = vld [vmem:[%s2614_s13 + $0xd8] sm:$0xf0]  ;;  %v616_v18 = vperm.slane %v2237_v63, 0  ;;  %v1748_v24 = vld [vmem:[%s2614_s13 + $0x4] sm:$0xf0] }
  0xe2   :  { %v1515_v25 = vld [vmem:[%s2614_s13 + $0xc0] sm:$0xf]  ;;  %v617_v61 = vperm.slane %v2237_v63, 1 }
  0xe3   :  { %1381 = vmatmul.msk.bf16.vlgmr.msra.gmra.mxu0 %vm388_vm7, %v386_v29  ;;  %1382 = vmatmul.msk.bf16.vlgmr.msra.gmra.mxu2 %vm388_vm7, %v384_v30  ;;  %v1469_v29 = vld [vmem:[%s2614_s13 + $0x68] sm:$0xf0] }
  0xe4   :  { %593 = vmatpush.bf16.msra.mxu2 %v1408_v55  ;;  %606 = vmatpush.bf16.msra.mxu0 %v1412_v7  ;;  %v1472_v30 = vor.u32 %v1759_v26, %v1469_v29  ;;  %v1436_v55 = vor.u32 %v1752_v52, %v1435_v51  ;;  %v1774_v7 = vld [vmem:[%s2614_s13 + $0xd4] sm:$0xf0]  ;;  %v1421_v29 = vld [vmem:[%s2614_s13 + $0x8] sm:$0xf0] }
  0xe5   :  { %847 = vmatpush.bf16.msrb.mxu1 %v1468_v28  ;;  %v1747_v28 = vld [vmem:[%s2614_s13 + $0x4] sm:$0xf] }
 0x155   :  { %v2132_v13 = vpop.f32.mrf.mxu1 }
 0x15d   :  { %v555_v27 = vpop.f32.mrf.mxu1 }
 0x160   :  { %v405_v31 = vpop.f32.mrf.mxu0 }
 0x166   :  { %v424_v1 = vpop.f32.mrf.mxu2 }
 0x167   :  { %v425_v32 = vadd.f32 %v424_v1, %v405_v31 }
 0x168   :  { %v407_v33 = vpop.f32.mrf.mxu0 }
 0x169   :  { %v432_v34 = vadd.f32 %v1837_v4, %v425_v32  ;;  %v1758_v4 = vld [vmem:[%s2614_s13 + $0x54] sm:$0xf0]  ;;  %v1461_v32 = vld [vmem:[%s2614_s13 + $0x58] sm:$0xf0] }
 0x16a   :  { %v1460_v1 = vor.u32 %v1758_v4, %v1459_v17  ;;  %v1464_v33 = vor.u32 %v1757_v20, %v1461_v32  ;;  %v1424_v17 = vor.u32 %v1747_v28, %v1421_v29  ;;  %v1771_v4 = vld [vmem:[%s2614_s13 + $0xc4] sm:$0xf]  ;;  %v1517_v20 = vld [vmem:[%s2614_s13 + $0xc8] sm:$0xf0] }
 0x16b   :  { %v433_v38 = vmin.f32 %v432_v34, 20.0  ;;  %vm442_vm8 = vcmp.gt.f32.partialorder %v432_v34, 20.0 }
 0x16c   :  { %848 = vmatpush.bf16.msrb.mxu1 %v1460_v1  ;;  %v1520_v1 = vor.u32 %v1771_v4, %v1517_v20  ;;  %v1671_v20 = vld [vmem:[%s2616_s15 + $0xf8] sm:$0xf0] }
 0x16d   :  { %v434_v39 = vmul.f32 1.442695, %v433_v38 }
 0x16e   :  { %v426_v40 = vpop.f32.mrf.mxu2 }
 0x16f   :  { %1840 = vpow2.f32 %v434_v39  ;;  %v1456_v39 = vor.u32 %v1755_v36, %v1453_v37  ;;  %v1443_v40 = vld [vmem:[%s2614_s13 + $0x30] sm:$0xf]  ;;  %v1509_v36 = vld [vmem:[%s2614_s13 + $0xb8] sm:$0xf0] }
 0x175   :  { %v1841_v42 = vpop.eup %1840 }
 0x176   :  { %v436_v43 = vadd.f32 1.0, %v1841_v42  ;;  %v1754_v42 = vld [vmem:[%s2614_s13 + $0x34] sm:$0xf0] }
 0x178   :  { %v437_v44 = vmul.f32 %v436_v43, %v436_v43  ;;  %v1539_v43 = vld [vmem:[%s2614_s13 + $0xf0] sm:$0xf] }
 0x17a   :  { %v439_v19 = vadd.f32 1.0, %v437_v44  ;;  %v1383_v45 = vadd.f32 -1.0, %v437_v44  ;;  %v1444_v44 = vor.u32 %v1754_v42, %v1443_v40  ;;  %v1499_v40 = vld [vmem:[%s2614_s13 + $0xa0] sm:$0xf]  ;;  %v1768_v42 = vld [vmem:[%s2614_s13 + $0xa4] sm:$0xf0] }
 0x17c   :  { %1842 = vrcp.f32 %v439_v19  ;;  %v1778_v19 = vld [vmem:[%s2614_s13 + $0xf4] sm:$0xf0] }
 0x182   :  { %v1843_v46 = vpop.eup %1842 }
 0x183   :  { %v441_v47 = vmul.f32 %v1843_v46, %v1383_v45  ;;  %v1753_v45 = vld [vmem:[%s2614_s13 + $0x34] sm:$0xf]  ;;  %v1445_v46 = vld [vmem:[%s2614_s13 + $0x38] sm:$0xf0] }
 0x185   :  { %v443_v48 = vmul.f32 %v441_v47, %v432_v34  ;;  %v1540_v47 = vor.u32 %v1778_v19, %v1539_v43  ;;  %v1767_v43 = vld [vmem:[%s2614_s13 + $0xa4] sm:$0xf]  ;;  %v1500_v19 = vor.u32 %v1768_v42, %v1499_v40  ;;  %v1607_v42 = vld [vmem:[%s2616_s15 + $0x78] sm:$0xf0] }
 0x187   :  { %v444_v49 = vsel %vm442_vm8, %v432_v34, %v443_v48  ;;  %v1451_v34 = vld [vmem:[%s2614_s13 + $0x40] sm:$0xf]  ;;  %v1448_v48 = vor.u32 %v1753_v45, %v1445_v46  ;;  %v1501_v45 = vld [vmem:[%s2614_s13 + $0xa8] sm:$0xf0] }
 0x188   :  { %v445_v41 = vpack.c.bf16 %v444_v49, %v444_v49  ;;  %v1452_v38 = vor.u32 %v1756_v35, %v1451_v34  ;;  %v1777_v49 = vld [vmem:[%s2614_s13 + $0xf4] sm:$0xf] }
 0x189   :  { %v1769_v34 = vld [vmem:[%s2614_s13 + $0xb4] sm:$0xf] }
 0x18a   :  { %1392 = vmatmul.msk.bf16.vlgmr.msrb.gmra.mxu2 %vm466_vm9, %v445_v41  ;;  %849 = vmatpush.bf16.msrb.mxu1 %v1452_v38  ;;  %v1541_v41 = vld [vmem:[%s2614_s13 + $0xf8] sm:$0xf0]  ;;  %v1512_v37 = vor.u32 %v1769_v34, %v1509_v36 }
 0x18b   :  { %872 = vmatpush.bf16.msrb.mxu2 %v1480_v23  ;;  %v1544_v50 = vor.u32 %v1777_v49, %v1541_v41  ;;  %v1419_v23 = vld [vmem:[%s2614_s13] sm:$0xf]  ;;  %v1766_v49 = vld [vmem:[%s2614_s13 + $0x94] sm:$0xf0]  ;;  %v1765_v41 = vld [vmem:[%s2614_s13 + $0x94] sm:$0xf] }
 0x18c   :  { %v1420_v27 = vor.u32 %v1748_v24, %v1419_v23 }
 0x18e   :  { %850 = vmatpush.bf16.msrb.mxu1 %v1444_v44 }
 0x18f   :  { %873 = vmatpush.bf16.msrb.mxu2 %v1472_v30 }
 0x192   :  { %851 = vmatpush.bf16.msrb.mxu1 %v1436_v55  ;;  %v1764_v55 = vld [vmem:[%s2614_s13 + $0x84] sm:$0xf0] }
 0x193   :  { %874 = vmatpush.bf16.msrb.mxu2 %v1464_v33  ;;  %v1770_v33 = vld [vmem:[%s2614_s13 + $0xb4] sm:$0xf0]  ;;  %v1484_v62 = vor.u32 %v1764_v55, %v1483_v53  ;;  %v1645_v55 = vld [vmem:[%s2616_s15 + $0xc0] sm:$0xf] }
 0x197   :  { %875 = vmatpush.bf16.msrb.mxu2 %v1456_v39 }
 0x19a   :  { %1413 = vmatmul.msk.bf16.vlgmr.msra.gmra.mxu2 %vm500_vm10, %v570_v60 }
 0x19b   :  { %876 = vmatpush.bf16.msrb.mxu2 %v1448_v48  ;;  %v1491_v48 = vld [vmem:[%s2614_s13 + $0x90] sm:$0xf] }
 0x19c   :  { %v1492_v51 = vor.u32 %v1766_v49, %v1491_v48  ;;  %v1597_v49 = vld [vmem:[%s2616_s15 + $0x60] sm:$0xf] }
 0x20d   :  { %v479_v9 = vpop.f32.mrf.mxu2 }
 0x20e   :  { %v480_v10 = vadd.f32 %v1838_v8, %v479_v9  ;;  %v1749_v8 = vld [vmem:[%s2614_s13 + $0x14] sm:$0xf]  ;;  %v1429_v9 = vld [vmem:[%s2614_s13 + $0x18] sm:$0xf0] }
 0x210   :  { %v487_v11 = vpack.c.bf16 %v480_v10, %v480_v10  ;;  %v1524_v10 = vor.u32 %v1774_v7, %v1523_v5 }
 0x212   :  { %1401 = vmatmul.msk.bf16.vlgmr.msra.gmra.mxu3 %vm500_vm10, %v487_v11  ;;  %1402 = vmatmul.msk.bf16.vlgmr.msrb.gmra.mxu0 %vm500_vm10, %v487_v11  ;;  %v1432_v11 = vor.u32 %v1749_v8, %v1429_v9 }
 0x213   :  { %859 = vmatpush.bf16.msra.mxu3 %v1540_v47  ;;  %885 = vmatpush.bf16.msrb.mxu0 %v1544_v50  ;;  %v1504_v47 = vor.u32 %v1767_v43, %v1501_v45  ;;  %v1493_v50 = vld [vmem:[%s2614_s13 + $0x98] sm:$0xf0]  ;;  %v1805_v45 = vld [vmem:[%s2616_s15 + $0xd4] sm:$0xf] }
 0x214   :  { %v1496_v52 = vor.u32 %v1765_v41, %v1493_v50  ;;  %v1792_v41 = vld [vmem:[%s2616_s15 + $0x64] sm:$0xf0]  ;;  %v1791_v50 = vld [vmem:[%s2616_s15 + $0x64] sm:$0xf] }
 0x215   :  { %v481_v12 = vpop.f32.mrf.mxu2 }
 0x216   :  { %v1773_v12 = vld [vmem:[%s2614_s13 + $0xd4] sm:$0xf] }
 0x217   :  { %860 = vmatpush.bf16.msra.mxu3 %v1532_v59  ;;  %886 = vmatpush.bf16.msrb.mxu0 %v1536_v0  ;;  %v1528_v21 = vor.u32 %v1773_v12, %v1525_v15 }
 0x21b   :  { %861 = vmatpush.bf16.msra.mxu3 %v1524_v10  ;;  %887 = vmatpush.bf16.msrb.mxu0 %v1528_v21 }
 0x21d   :  { %v2134_v14 = vpop.f32.mrf.mxu2 }
 0x21f   :  { %888 = vmatpush.bf16.msrb.mxu0 %v1520_v1 }
 0x222   :  { %1404 = vmatmul.msk.bf16.vlgmr.msrb.gmra.mxu3 %vm388_vm7, %v485_v6  ;;  %1414 = vmatmul.msk.bf16.vlgmr.msra.gmra.mxu0 %vm500_vm10, %v570_v60  ;;  %v1440_v60 = vor.u32 %v1751_v57, %v1437_v58  ;;  %v1428_v6 = vor.u32 %v1750_v3, %v1427_v2  ;;  %v1485_v57 = vld [vmem:[%s2614_s13 + $0x88] sm:$0xf0] }
 0x223   :  { %889 = vmatpush.bf16.msrb.mxu0 %v1512_v37  ;;  %v1488_v3 = vor.u32 %v1763_v56, %v1485_v57  ;;  %v1794_v37 = vld [vmem:[%s2616_s15 + $0x74] sm:$0xf0]  ;;  %v1804_v56 = vld [vmem:[%s2616_s15 + $0xc4] sm:$0xf0]  ;;  %v1803_v57 = vld [vmem:[%s2616_s15 + $0xc4] sm:$0xf] }
 0x224   :  { %877 = vmatpush.bf16.msrb.mxu2 %v1440_v60  ;;  %852 = vmatpush.bf16.msrb.mxu1 %v1428_v6 }
 0x225   :  { %v597_v31 = vpop.f32.mrf.mxu2 }
 0x227   :  { %890 = vmatpush.bf16.msrb.mxu0 %v1504_v47  ;;  %v1655_v47 = vld [vmem:[%s2616_s15 + $0xd8] sm:$0xf0] }
 0x228   :  { %878 = vmatpush.bf16.msrb.mxu2 %v1432_v11  ;;  %853 = vmatpush.bf16.msrb.mxu1 %v1420_v27  ;;  %v1658_v48 = vor.u32 %v1805_v45, %v1655_v47  ;;  %v1796_v45 = vld [vmem:[%s2616_s15 + $0x84] sm:$0xf0] }
 0x22b   :  { %891 = vmatpush.bf16.msrb.mxu0 %v1496_v52  ;;  %v1599_v52 = vld [vmem:[%s2616_s15 + $0x68] sm:$0xf0] }
 0x22c   :  { %879 = vmatpush.bf16.msrb.mxu2 %v1424_v17  ;;  %v1809_v17 = vld [vmem:[%s2616_s15 + $0xf4] sm:$0xf]  ;;  %v1602_v53 = vor.u32 %v1791_v50, %v1599_v52  ;;  %v1782_v52 = vld [vmem:[%s2616_s15 + $0x14] sm:$0xf0] }
 0x22d   :  { %v1674_v1 = vor.u32 %v1809_v17, %v1671_v20  ;;  %v1575_v20 = vld [vmem:[%s2616_s15 + $0x38] sm:$0xf0] }
 0x22f   :  { %892 = vmatpush.bf16.msrb.mxu0 %v1488_v3 }
 0x233   :  { %1161 = vmatpush.bf16.msra.mxu0 %v1674_v1 }
 0x28f   :  { %v2217_v54 = vpop.f32.mrf.mxu0 }
 0x295   :  { %v513_v16 = vpop.f32.mrf.mxu3 }
 0x296   :  { %v554_v22 = vadd.f32 %v2132_v13, %v513_v16  ;;  %v1772_v13 = vld [vmem:[%s2614_s13 + $0xc4] sm:$0xf0] }
 0x297   :  { %v528_v26 = vpop.f32.mrf.mxu0  ;;  %v1516_v31 = vor.u32 %v1772_v13, %v1515_v25 }
 0x298   :  { %v612_v30 = vadd.f32 %v2134_v14, %v554_v22  ;;  %v1507_v14 = vld [vmem:[%s2614_s13 + $0xb0] sm:$0xf] }
 0x299   :  { %862 = vmatpush.bf16.msra.mxu3 %v1516_v31  ;;  %v1508_v35 = vor.u32 %v1770_v33, %v1507_v14  ;;  %v1810_v31 = vld [vmem:[%s2616_s15 + $0xf4] sm:$0xf0]  ;;  %v1808_v14 = vld [vmem:[%s2616_s15 + $0xe4] sm:$0xf0]  ;;  %v1807_v33 = vld [vmem:[%s2616_s15 + $0xe4] sm:$0xf] }
 0x29a   :  { %v2290_v32 = vadd.f32 %v616_v18, %v612_v30  ;;  %v1669_v30 = vld [vmem:[%s2616_s15 + $0xf0] sm:$0xf] }
 0x29b   :  { %v1670_v4 = vor.u32 %v1810_v31, %v1669_v30  ;;  %v1785_v30 = vld [vmem:[%s2616_s15 + $0x34] sm:$0xf]  ;;  %v680_v31 = vld [vmem:[%s2615_s14] sm:$0x3] }
 0x29c   :  { %v622_v38 = vmin.f32 %v2290_v32, 20.0  ;;  %vm640_vm0 = vcmp.gt.f32.partialorder %v2290_v32, 20.0  ;;  %v1578_v1 = vor.u32 %v1785_v30, %v1575_v20 }
 0x29d   :  { %v515_v39 = vpop.f32.mrf.mxu3  ;;  %863 = vmatpush.bf16.msra.mxu3 %v1508_v35  ;;  %v1663_v35 = vld [vmem:[%s2616_s15 + $0xe8] sm:$0xf0] }
 0x29e   :  { %v624_v44 = vmul.f32 1.442695, %v622_v38  ;;  %v1666_v36 = vor.u32 %v1807_v33, %v1663_v35  ;;  %v1605_v38 = vld [vmem:[%s2616_s15 + $0x70] sm:$0xf]  ;;  %v1793_v39 = vld [vmem:[%s2616_s15 + $0x74] sm:$0xf] }
 0x29f   :  { %v608_v46 = vpop.f32.mrf.mxu0  ;;  %v1606_v40 = vor.u32 %v1794_v37, %v1605_v38  ;;  %v1610_v43 = vor.u32 %v1793_v39, %v1607_v42  ;;  %v1797_v33 = vld [vmem:[%s2616_s15 + $0x94] sm:$0xf]  ;;  %v1565_v37 = vld [vmem:[%s2616_s15 + $0x20] sm:$0xf]  ;;  %v1784_v39 = vld [vmem:[%s2616_s15 + $0x24] sm:$0xf0] }
 0x2a0   :  { %1844 = vpow2.f32 %v624_v44  ;;  %1162 = vmatpush.bf16.msra.mxu0 %v1666_v36  ;;  %v1653_v44 = vld [vmem:[%s2616_s15 + $0xd0] sm:$0xf]  ;;  %v1623_v36 = vld [vmem:[%s2616_s15 + $0x98] sm:$0xf0]  ;;  %v1566_v42 = vor.u32 %v1784_v39, %v1565_v37  ;;  %v1824_v37 = vld [vmem:[%s2618_s17 + $0x68] sm:$0xff] }
 0x2a1   :  { %864 = vmatpush.bf16.msra.mxu3 %v1500_v19  ;;  %v1806_v19 = vld [vmem:[%s2616_s15 + $0xd4] sm:$0xf0]  ;;  %1122 = vmatpush.bf16.msra.mxu1 %v1606_v40  ;;  %v1626_v38 = vor.u32 %v1797_v33, %v1623_v36  ;;  %v1783_v40 = vld [vmem:[%s2616_s15 + $0x24] sm:$0xf]  ;;  %v1817_v33 = vld [vmem:[%s2618_s17 + $0x30] sm:$0xff] }
 0x2a2   :  { %1148 = vmatpush.bf16.msra.mxu2 %v1610_v43  ;;  %v1567_v43 = vld [vmem:[%s2616_s15 + $0x28] sm:$0xf0]  ;;  %v1825_v36 = vld [vmem:[%s2618_s17 + $0x70] sm:$0xff]  ;;  %v1814_v39 = vld [vmem:[%s2618_s17 + $0x18] sm:$0xff] }
 0x2a4   :  { %1163 = vmatpush.bf16.msra.mxu0 %v1658_v48 }
 0x2a5   :  { %v566_v58 = vpop.f32.mrf.mxu3  ;;  %865 = vmatpush.bf16.msra.mxu3 %v1492_v51  ;;  %v1598_v51 = vor.u32 %v1792_v41, %v1597_v49  ;;  %v1615_v49 = vld [vmem:[%s2616_s15 + $0x88] sm:$0xf0] }
 0x2a6   :  { %v1845_v59 = vpop.eup %1844  ;;  %v567_v60 = vadd.f32 %v566_v58, %v2217_v54  ;;  %v1646_v58 = vor.u32 %v1804_v56, %v1645_v55  ;;  %1149 = vmatpush.bf16.msra.mxu2 %v1602_v53  ;;  %v1781_v53 = vld [vmem:[%s2616_s15 + $0x14] sm:$0xf] }
 0x2a7   :  { %v628_v0 = vadd.f32 1.0, %v1845_v59  ;;  %v610_v2 = vpop.f32.mrf.mxu0  ;;  %1123 = vmatpush.bf16.msra.mxu1 %v1598_v51  ;;  %v1647_v59 = vld [vmem:[%s2616_s15 + $0xc8] sm:$0xf0]  ;;  %v1557_v51 = vld [vmem:[%s2616_s15 + $0x10] sm:$0xf] }
 0x2a8   :  { %v613_v5 = vadd.f32 %v608_v46, %v567_v60  ;;  %v1654_v46 = vor.u32 %v1806_v19, %v1653_v44  ;;  %v1650_v60 = vor.u32 %v1803_v57, %v1647_v59  ;;  %v1570_v44 = vor.u32 %v1783_v40, %v1567_v43  ;;  %v1613_v19 = vld [vmem:[%s2616_s15 + $0x80] sm:$0xf]  ;;  %v1559_v57 = vld [vmem:[%s2616_s15 + $0x18] sm:$0xf0] }
 0x2a9   :  { %v630_v6 = vmul.f32 %v628_v0, %v628_v0  ;;  %866 = vmatpush.bf16.msra.mxu3 %v1484_v62  ;;  %v1790_v62 = vld [vmem:[%s2616_s15 + $0x54] sm:$0xf0]  ;;  %v1789_v0 = vld [vmem:[%s2616_s15 + $0x54] sm:$0xf]  ;;  %v1614_v48 = vor.u32 %v1796_v45, %v1613_v19  ;;  %v1558_v56 = vor.u32 %v1782_v52, %v1557_v51  ;;  %v1823_v40 = vld [vmem:[%s2618_s17 + $0x60] sm:$0xff] }
 0x2aa   :  { %v621_v7 = vadd.f32 %v617_v61, %v613_v5  ;;  %v1589_v61 = vld [vmem:[%s2616_s15 + $0x50] sm:$0xf]  ;;  %v1591_v5 = vld [vmem:[%s2616_s15 + $0x58] sm:$0xf0]  ;;  %1164 = vmatpush.bf16.msra.mxu0 %v1650_v60  ;;  %v1562_v60 = vor.u32 %v1781_v53, %v1559_v57  ;;  %v1812_v45 = vld [vmem:[%s2618_s17 + $0x8] sm:$0xff] }
 0x2ab   :  { %v634_v8 = vadd.f32 1.0, %v630_v6  ;;  %v1415_v54 = vadd.f32 -1.0, %v630_v6  ;;  %v1590_v3 = vor.u32 %v1790_v62, %v1589_v61  ;;  %v1594_v6 = vor.u32 %v1789_v0, %v1591_v5  ;;  %v1549_v62 = vld [vmem:[%s2616_s15] sm:$0xf]  ;;  %v1780_v0 = vld [vmem:[%s2616_s15 + $0x4] sm:$0xf0] }
 0x2ac   :  { %v623_v9 = vmin.f32 %v621_v7, 20.0  ;;  %vm641_vm11 = vcmp.gt.f32.partialorder %v621_v7, 20.0  ;;  %v1779_v5 = vld [vmem:[%s2616_s15 + $0x4] sm:$0xf]  ;;  %v1822_v19 = vld [vmem:[%s2618_s17 + $0x58] sm:$0xff]  ;;  %v1820_v52 = vld [vmem:[%s2618_s17 + $0x48] sm:$0xff] }
 0x2ad   :  { %1846 = vrcp.f32 %v634_v8  ;;  %v568_v10 = vpop.f32.mrf.mxu3  ;;  %1135 = vmatpush.bf16.msrb.mxu3 %v1670_v4  ;;  %v1802_v8 = vld [vmem:[%s2616_s15 + $0xb4] sm:$0xf0]  ;;  %1124 = vmatpush.bf16.msra.mxu1 %v1590_v3  ;;  %v1550_v3 = vor.u32 %v1780_v0, %v1549_v62  ;;  %v1819_v57 = vld [vmem:[%s2618_s17 + $0x40] sm:$0xff] }
 0x2ae   :  { %v626_v11 = vmul.f32 1.442695, %v623_v9  ;;  %v1801_v9 = vld [vmem:[%s2616_s15 + $0xb4] sm:$0xf]  ;;  %1150 = vmatpush.bf16.msra.mxu2 %v1594_v6  ;;  %v1551_v6 = vld [vmem:[%s2616_s15 + $0x8] sm:$0xf0] }
 0x2b0   :  { %1848 = vpow2.f32 %v626_v11  ;;  %v1639_v11 = vld [vmem:[%s2616_s15 + $0xb8] sm:$0xf0] }
 0x2b3   :  { %v1847_v12 = vpop.eup %1846 }
 0x2b4   :  { %v638_v63 = vmul.f32 %v1847_v12, %v1415_v54  ;;  %v1642_v54 = vor.u32 %v1801_v9, %v1639_v11  ;;  %v1581_v12 = vld [vmem:[%s2616_s15 + $0x40] sm:$0xf]  ;;  %v1554_v9 = vor.u32 %v1779_v5, %v1551_v6 }
 0x2b6   :  { %v1849_v15 = vpop.eup %1848  ;;  %v642_v16 = vmul.f32 %v638_v63, %v2290_v32  ;;  %v1788_v63 = vld [vmem:[%s2616_s15 + $0x44] sm:$0xf0]  ;;  %1165 = vmatpush.bf16.msra.mxu0 %v1642_v54 }
 0x2b7   :  { %v629_v18 = vadd.f32 1.0, %v1849_v15  ;;  %v1787_v15 = vld [vmem:[%s2616_s15 + $0x44] sm:$0xf] }
 0x2b8   :  { %v644_v21 = vsel %vm640_vm0, %v2290_v32, %v642_v16  ;;  %v1661_v32 = vld [vmem:[%s2616_s15 + $0xe0] sm:$0xf]  ;;  %v1582_v16 = vor.u32 %v1788_v63, %v1581_v12 }
 0x2b9   :  { %v631_v22 = vmul.f32 %v629_v18, %v629_v18  ;;  %v646_v23 = vpack.c.bf16 %v644_v21, %v644_v21  ;;  %v1662_v34 = vor.u32 %v1808_v14, %v1661_v32  ;;  %v1583_v18 = vld [vmem:[%s2616_s15 + $0x48] sm:$0xf0]  ;;  %v1621_v32 = vld [vmem:[%s2616_s15 + $0x90] sm:$0xf]  ;;  %v1798_v14 = vld [vmem:[%s2616_s15 + $0x94] sm:$0xf0] }
 0x2ba   :  { %v1586_v21 = vor.u32 %v1787_v15, %v1583_v18  ;;  %1125 = vmatpush.bf16.msra.mxu1 %v1582_v16  ;;  %v1622_v35 = vor.u32 %v1798_v14, %v1621_v32  ;;  %v1818_v14 = vld [vmem:[%s2618_s17 + $0x38] sm:$0xff] }
 0x2bb   :  { %v635_v24 = vadd.f32 1.0, %v631_v22  ;;  %854 = vmatmul.bf16.vlgmr.msrb.gmra.mxu1 %v646_v23  ;;  %880 = vmatmul.bf16.vlgmr.msrb.gmra.mxu2 %v646_v23  ;;  %v1416_v25 = vadd.f32 -1.0, %v631_v22  ;;  %v1629_v22 = vld [vmem:[%s2616_s15 + $0xa0] sm:$0xf]  ;;  %v1800_v23 = vld [vmem:[%s2616_s15 + $0xa4] sm:$0xf0] }
 0x2bc   :  { %1136 = vmatpush.bf16.msrb.mxu3 %v1662_v34  ;;  %1151 = vmatpush.bf16.msra.mxu2 %v1586_v21  ;;  %v683_v34 = vperm.slane %v680_v31, 1 }
 0x2bd   :  { %1850 = vrcp.f32 %v635_v24  ;;  %v1799_v24 = vld [vmem:[%s2616_s15 + $0xa4] sm:$0xf] }
 0x2c0   :  { %1137 = vmatpush.bf16.msrb.mxu3 %v1654_v46  ;;  %1152 = vmatpush.bf16.msra.mxu2 %v1578_v1  ;;  %v1795_v46 = vld [vmem:[%s2616_s15 + $0x84] sm:$0xf] }
 0x2c1   :  { %v1618_v50 = vor.u32 %v1795_v46, %v1615_v49 }
 0x2c3   :  { %v1851_v26 = vpop.eup %1850 }
 0x2c4   :  { %v639_v27 = vmul.f32 %v1851_v26, %v1416_v25  ;;  %1138 = vmatpush.bf16.msrb.mxu3 %v1646_v58  ;;  %v1630_v26 = vor.u32 %v1800_v23, %v1629_v22  ;;  %1153 = vmatpush.bf16.msra.mxu2 %v1570_v44  ;;  %v682_v58 = vperm.slane %v680_v31, 0  ;;  %v956_v44 = vld [vmem:[%s2617_s16] sm:$0x3] }
 0x2c5   :  { %v958_v46 = vperm.slane %v956_v44, 0 }
 0x2c6   :  { %v643_v13 = vmul.f32 %v639_v27, %v621_v7  ;;  %v1631_v27 = vld [vmem:[%s2616_s15 + $0xa8] sm:$0xf0] }
 0x2c8   :  { %v645_v28 = vsel %vm641_vm11, %v621_v7, %v643_v13  ;;  %v1637_v7 = vld [vmem:[%s2616_s15 + $0xb0] sm:$0xf]  ;;  %v1634_v13 = vor.u32 %v1799_v24, %v1631_v27  ;;  %1154 = vmatpush.bf16.msra.mxu2 %v1562_v60 }
 0x2c9   :  { %v647_v29 = vpack.c.bf16 %v645_v28, %v645_v28  ;;  %v1638_v10 = vor.u32 %v1802_v8, %v1637_v7  ;;  %v1573_v28 = vld [vmem:[%s2616_s15 + $0x30] sm:$0xf] }
 0x2ca   :  { %1166 = vmatpush.bf16.msra.mxu0 %v1634_v13 }
 0x2cb   :  { %867 = vmatmul.bf16.vlgmr.msra.gmra.mxu3 %v647_v29  ;;  %893 = vmatmul.bf16.vlgmr.msrb.gmra.mxu0 %v647_v29  ;;  %v1786_v29 = vld [vmem:[%s2616_s15 + $0x34] sm:$0xf0] }
 0x2cc   :  { %1139 = vmatpush.bf16.msrb.mxu3 %v1638_v10  ;;  %v1574_v4 = vor.u32 %v1786_v29, %v1573_v28  ;;  %1155 = vmatpush.bf16.msra.mxu2 %v1554_v9 }
 0x2ce   :  { %1126 = vmatpush.bf16.msra.mxu1 %v1574_v4  ;;  %1167 = vmatpush.bf16.msra.mxu0 %v1626_v38  ;;  %v1815_v38 = vld [vmem:[%s2618_s17 + $0x20] sm:$0xff] }
 0x2d0   :  { %1140 = vmatpush.bf16.msrb.mxu3 %v1630_v26 }
 0x2d2   :  { %1127 = vmatpush.bf16.msra.mxu1 %v1566_v42  ;;  %1168 = vmatpush.bf16.msra.mxu0 %v1618_v50  ;;  %v1813_v42 = vld [vmem:[%s2618_s17 + $0x10] sm:$0xff] }
 0x2d4   :  { %1141 = vmatpush.bf16.msrb.mxu3 %v1622_v35  ;;  %v1816_v35 = vld [vmem:[%s2618_s17 + $0x28] sm:$0xff] }
 0x2d6   :  { %1128 = vmatpush.bf16.msra.mxu1 %v1558_v56 }
 0x2d8   :  { %1142 = vmatpush.bf16.msrb.mxu3 %v1614_v48 }
 0x2da   :  { %1129 = vmatpush.bf16.msra.mxu1 %v1550_v3 }
 0x2de   :  { %1332 = vmatpush.bf16.msrb.mxu1 %v1818_v14 }
 0x2e2   :  { %1333 = vmatpush.bf16.msrb.mxu1 %v1817_v33 }
 0x2e6   :  { %1334 = vmatpush.bf16.msrb.mxu1 %v1816_v35 }
 0x2ea   :  { %1335 = vmatpush.bf16.msrb.mxu1 %v1815_v38 }
 0x2ee   :  { %1336 = vmatpush.bf16.msrb.mxu1 %v1814_v39 }
 0x2f2   :  { %1337 = vmatpush.bf16.msrb.mxu1 %v1813_v42 }
 0x2f6   :  { %1338 = vmatpush.bf16.msrb.mxu1 %v1812_v45 }
 0x338   :  { %v2427_v2 = vpop.f32.mrf.mxu1 }
 0x339   :  { %v856_v7 = vadd.f32 %v2427_v2, %v682_v58 }
 0x33e   :  { %v881_v25 = vpop.f32.mrf.mxu2 }
 0x33f   :  { %v882_v41 = vadd.f32 %v881_v25, %v683_v34  ;;  %v1826_v34 = vld [vmem:[%s2618_s17 + $0x78] sm:$0xff] }
 0x340   :  { %v857_v17 = vpop.f32.mrf.mxu1  ;;  %1345 = vmatpush.bf16.msra.mxu3 %v1826_v34 }
 0x344   :  { %1346 = vmatpush.bf16.msra.mxu3 %v1825_v36 }
 0x346   :  { %v883_v47 = vpop.f32.mrf.mxu2 }
 0x347   :  { %v1821_v47 = vld [vmem:[%s2618_s17 + $0x50] sm:$0xff] }
 0x348   :  { %v894_v55 = vpop.f32.mrf.mxu0  ;;  %1347 = vmatpush.bf16.msra.mxu3 %v1824_v37 }
 0x349   :  { %v895_v59 = vadd.f32 %v894_v55, %v882_v41  ;;  %v1811_v41 = vld [vmem:[%s2618_s17] sm:$0xff]  ;;  %v959_v55 = vperm.slane %v956_v44, 1 }
 0x34a   :  { %1339 = vmatpush.bf16.msrb.mxu1 %v1811_v41 }
 0x34b   :  { %v899_v61 = vmin.f32 %v895_v59, 20.0  ;;  %vm917_vm12 = vcmp.gt.f32.partialorder %v895_v59, 20.0 }
 0x34c   :  { %1348 = vmatpush.bf16.msra.mxu3 %v1823_v40 }
 0x34d   :  { %v902_v8 = vmul.f32 1.442695, %v899_v61 }
 0x34e   :  { %v868_v10 = vpop.f32.mrf.mxu3 }
 0x34f   :  { %1852 = vpow2.f32 %v902_v8  ;;  %v869_v11 = vadd.f32 %v868_v10, %v856_v7 }
 0x350   :  { %v896_v54 = vpop.f32.mrf.mxu0  ;;  %1349 = vmatpush.bf16.msra.mxu3 %v1822_v19 }
 0x351   :  { %v898_v12 = vmin.f32 %v869_v11, 20.0  ;;  %vm916_vm13 = vcmp.gt.f32.partialorder %v869_v11, 20.0 }
 0x353   :  { %v900_v63 = vmul.f32 1.442695, %v898_v12 }
 0x354   :  { %1350 = vmatpush.bf16.msra.mxu3 %v1821_v47 }
 0x355   :  { %v1853_v15 = vpop.eup %1852  ;;  %1854 = vpow2.f32 %v900_v63 }
 0x356   :  { %v905_v16 = vadd.f32 1.0, %v1853_v15  ;;  %v870_v18 = vpop.f32.mrf.mxu3 }
 0x358   :  { %v907_v21 = vmul.f32 %v905_v16, %v905_v16  ;;  %1351 = vmatpush.bf16.msra.mxu3 %v1820_v52 }
 0x35a   :  { %v911_v22 = vadd.f32 1.0, %v907_v21  ;;  %v1546_v26 = vadd.f32 -1.0, %v907_v21 }
 0x35b   :  { %v1855_v23 = vpop.eup %1854 }
 0x35c   :  { %1856 = vrcp.f32 %v911_v22  ;;  %v904_v24 = vadd.f32 1.0, %v1855_v23  ;;  %1352 = vmatpush.bf16.msra.mxu3 %v1819_v57 }
 0x35e   :  { %v906_v2 = vmul.f32 %v904_v24, %v904_v24 }
 0x360   :  { %v910_v25 = vadd.f32 1.0, %v906_v2  ;;  %v1545_v29 = vadd.f32 -1.0, %v906_v2 }
 0x362   :  { %v1857_v27 = vpop.eup %1856  ;;  %1858 = vrcp.f32 %v910_v25 }
 0x363   :  { %v915_v13 = vmul.f32 %v1857_v27, %v1546_v26 }
 0x365   :  { %v919_v28 = vmul.f32 %v915_v13, %v895_v59 }
 0x367   :  { %v921_v30 = vsel %vm917_vm12, %v895_v59, %v919_v28 }
 0x368   :  { %v1859_v31 = vpop.eup %1858  ;;  %v923_v17 = vpack.c.bf16 %v921_v30, %v921_v30 }
 0x369   :  { %v914_v4 = vmul.f32 %v1859_v31, %v1545_v29  ;;  %v1839_v29 = vld [vmem:[%s2619_s18] ss:$0 sm:$0xff] }
 0x36a   :  { %1143 = vmatmul.bf16.vlgmr.msrb.gmra.mxu3 %v923_v17  ;;  %1169 = vmatmul.bf16.vlgmr.msra.gmra.mxu0 %v923_v17 }
 0x36b   :  { %v918_v20 = vmul.f32 %v914_v4, %v869_v11 }
 0x36d   :  { %v920_v1 = vsel %vm916_vm13, %v869_v11, %v918_v20 }
 0x36e   :  { %v922_v32 = vpack.c.bf16 %v920_v1, %v920_v1 }
 0x370   :  { %1130 = vmatmul.bf16.vlgmr.msra.gmra.mxu1 %v922_v32  ;;  %1156 = vmatmul.bf16.vlgmr.msra.gmra.mxu2 %v922_v32 }
 0x3e7   :  { %v1170_v43 = vpop.f32.mrf.mxu0 }
 0x3ed   :  { %v1131_v48 = vpop.f32.mrf.mxu1  ;;  %v1144_v49 = vpop.f32.mrf.mxu3 }
 0x3ee   :  { %v1132_v50 = vadd.f32 %v1131_v48, %v958_v46 }
 0x3ef   :  { %v1172_v51 = vpop.f32.mrf.mxu0 }
 0x3f0   :  { %v1145_v53 = vadd.f32 %v1144_v49, %v1132_v50 }
 0x3f2   :  { %v1174_v56 = vmin.f32 %v1145_v53, 20.0  ;;  %vm1192_vm14 = vcmp.gt.f32.partialorder %v1145_v53, 20.0 }
 0x3f3   :  { %v1157_v58 = vpop.f32.mrf.mxu2 }
 0x3f4   :  { %v1176_v59 = vmul.f32 1.442695, %v1174_v56  ;;  %v1158_v60 = vadd.f32 %v1157_v58, %v959_v55 }
 0x3f5   :  { %v1133_v61 = vpop.f32.mrf.mxu1  ;;  %v1146_v62 = vpop.f32.mrf.mxu3 }
 0x3f6   :  { %1860 = vpow2.f32 %v1176_v59  ;;  %v1171_v0 = vadd.f32 %v1170_v43, %v1158_v60 }
 0x3f8   :  { %v1175_v3 = vmin.f32 %v1171_v0, 20.0  ;;  %vm1193_vm15 = vcmp.gt.f32.partialorder %v1171_v0, 20.0 }
 0x3fa   :  { %v1178_v5 = vmul.f32 1.442695, %v1175_v3 }
 0x3fb   :  { %v1159_v6 = vpop.f32.mrf.mxu2 }
 0x3fc   :  { %v1861_v7 = vpop.eup %1860  ;;  %1862 = vpow2.f32 %v1178_v5 }
 0x3fd   :  { %v1180_v8 = vadd.f32 1.0, %v1861_v7 }
 0x3ff   :  { %v1182_v9 = vmul.f32 %v1180_v8, %v1180_v8 }
 0x401   :  { %v1186_v10 = vadd.f32 1.0, %v1182_v9  ;;  %v1675_v15 = vadd.f32 -1.0, %v1182_v9 }
 0x402   :  { %v1863_v11 = vpop.eup %1862 }
 0x403   :  { %1864 = vrcp.f32 %v1186_v10  ;;  %v1181_v54 = vadd.f32 1.0, %v1863_v11 }
 0x405   :  { %v1183_v12 = vmul.f32 %v1181_v54, %v1181_v54 }
 0x407   :  { %v1187_v63 = vadd.f32 1.0, %v1183_v12  ;;  %v1676_v22 = vadd.f32 -1.0, %v1183_v12 }
 0x409   :  { %v1865_v16 = vpop.eup %1864  ;;  %1866 = vrcp.f32 %v1187_v63 }
 0x40a   :  { %v1190_v18 = vmul.f32 %v1865_v16, %v1675_v15 }
 0x40c   :  { %v1194_v21 = vmul.f32 %v1190_v18, %v1145_v53 }
 0x40e   :  { %v1196_v23 = vsel %vm1192_vm14, %v1145_v53, %v1194_v21 }
 0x40f   :  { %v1867_v24 = vpop.eup %1866  ;;  %v1198_v2 = vpack.c.bf16 %v1196_v23, %v1196_v23 }
 0x410   :  { %v1191_v25 = vmul.f32 %v1867_v24, %v1676_v22 }
 0x411   :  { %1340 = vmatmul.bf16.vlgmr.msrb.gmra.mxu1 %v1198_v2 }
 0x412   :  { %v1195_v26 = vmul.f32 %v1191_v25, %v1171_v0 }
 0x414   :  { %v1197_v27 = vsel %vm1193_vm15, %v1171_v0, %v1195_v26 }
 0x415   :  { %v1199_v13 = vpack.c.bf16 %v1197_v27, %v1197_v27 }
 0x417   :  { %1353 = vmatmul.bf16.vlgmr.msra.gmra.mxu3 %v1199_v13 }
 0x48e   :  { %v1341_v28 = vpop.f32.mrf.mxu1 }
 0x48f   :  { %v1342_v31 = vadd.f32 %v1839_v29, %v1341_v28 }
 0x496   :  { %v1343_v30 = vpop.f32.mrf.mxu1 }
 0x49a   :  { %v1354_v17 = vpop.f32.mrf.mxu3 }
 0x49b   :  { %v1355_v4 = vadd.f32 %v1354_v17, %v1342_v31 }
 0x49d   :  { %1358 = vst [vmem:[#allocation2] sm:$0xff] %v1355_v4 }
 0x49e   :  { %1369 = dma.vmem_to_hbm [thread:$0]  %s1365_s20, 128, %s1367_s7, [#allocation3]  }
 0x4a2   :  { %v1356_v20 = vpop.f32.mrf.mxu3 }
 0x4a3   :  { %1892 = dma.done.wait [#allocation3], 128  }
 0x4a4   :  { %1893 = vsyncadd [#allocation3], 4294967168 }
 0x4a5   :  { %1374 = vsyncpa [#allocation3], 1 }

</bundles_post_ra>
